<compile_context>
chip_gen: v5e
topology: v5e:2x2
jax: 0.10.0
libtpu: 0.0.40
codegen_flags: <defaults>
</compile_context>

<pallas_src>
import math

import jax
import jax.numpy as jnp
from jax.experimental import pallas as pl
from jax.experimental.pallas import tpu as pltpu


def mv_lstm_kernel(x_ref, wih_ref, whh_ref, b_ref, wlin_ref, blin_ref,
                   out_ref, seq_buf, pre_buf):
    # x_ref:   (T, BB, H)   time-major, feature/batch padded input (f32)
    # wih_ref: (L, H, 4H)   input->gates weights, transposed, gates [i,f,o,g] (bf16)
    # whh_ref: (L, H, 4H)   hidden->gates weights, transposed, gates [i,f,o,g] (bf16)
    # b_ref:   (L, 1, 4H)   combined gate bias b_ih+b_hh, gates [i,f,o,g] (f32)
    # wlin_ref:(T, 1, H)    final linear weight, flatten-order matched (f32)
    # blin_ref:(1, 1)       final linear bias (SMEM scalar)
    # out_ref: (BB, 1)
    # seq_buf: (T, BB, H)   VMEM scratch: current layer's output sequence (f32)
    # pre_buf: (T, BB, 4H)  VMEM scratch: hoisted input projection + bias (f32)
    T, BB, H = seq_buf.shape
    L = wih_ref.shape[0]

    for l in range(L):                          # static layer loop
        wih = wih_ref[l]                        # (H, 4H) bf16
        whh = whh_ref[l]                        # (H, 4H) bf16
        b = b_ref[l]                            # (1, 4H) f32

        # Hoisted input projection: one big MXU matmul per layer, off the
        # serial critical path; bias folded in here (not inside step()).
        if l == 0:
            inp2d = x_ref[...].reshape(T * BB, H)
        else:
            inp2d = seq_buf[...].reshape(T * BB, H)
        pre_x = jnp.dot(inp2d.astype(jnp.bfloat16), wih,
                        preferred_element_type=jnp.float32) + b   # (T*BB, 4H)
        pre_buf[...] = pre_x.reshape(T, BB, 4 * H)

        def step(t, carry):
            h, c = carry
            # Only the hidden->gates matmul remains on the serial chain.
            pre = pre_buf[t] + jnp.dot(h.astype(jnp.bfloat16), whh,
                                       preferred_element_type=jnp.float32)
            act = jax.nn.sigmoid(pre[:, 0:3 * H])    # [i, f, o] in one slab
            i_g = act[:, 0:H]
            f_g = act[:, H:2 * H]
            o_g = act[:, 2 * H:3 * H]
            g_g = jnp.tanh(pre[:, 3 * H:4 * H])
            c_new = f_g * c + i_g * g_g
            h_new = o_g * jnp.tanh(c_new)
            seq_buf[t] = h_new                   # next layer's input / final output
            return (h_new, c_new)

        h0 = jnp.zeros((BB, H), jnp.float32)
        c0 = jnp.zeros((BB, H), jnp.float32)
        jax.lax.fori_loop(0, T, step, (h0, c0), unroll=True)

    # Final linear on flattened (B, T*H): T VPU multiply-adds, then exactly
    # one cross-lane (XLU) reduction.
    acc_h = seq_buf[0] * wlin_ref[0]
    for t in range(1, T):
        acc_h = acc_h + seq_buf[t] * wlin_ref[t]
    out_ref[...] = jnp.sum(acc_h, axis=-1, keepdims=True) + blin_ref[0, 0]


def mv_lstm_forward(x, params, n_hidden):
    """x: (B, T, F) float32, batch_first like the PyTorch module."""
    B, T, F = x.shape
    H = n_hidden
    L = params["wih"].shape[0]

    BB = 8                                     # batch block = one sublane group
    B_pad = ((B + BB - 1) // BB) * BB
    # Glue: transpose to time-major, zero-pad features F->H and batch B->B_pad.
    x_pad = jnp.zeros((T, B_pad, H), jnp.float32)
    x_pad = x_pad.at[:, :B, :F].set(
        jnp.transpose(x, (1, 0, 2)).astype(jnp.float32))

    out = pl.pallas_call(
        mv_lstm_kernel,
        out_shape=jax.ShapeDtypeStruct((B_pad, 1), jnp.float32),
        grid=(B_pad // BB,),
        in_specs=[
            pl.BlockSpec((T, BB, H), lambda b: (0, b, 0)),        # x_pad
            pl.BlockSpec((L, H, 4 * H), lambda b: (0, 0, 0)),     # wih (bf16)
            pl.BlockSpec((L, H, 4 * H), lambda b: (0, 0, 0)),     # whh (bf16)
            pl.BlockSpec((L, 1, 4 * H), lambda b: (0, 0, 0)),     # bias
            pl.BlockSpec((T, 1, H), lambda b: (0, 0, 0)),         # wlin
            pl.BlockSpec(memory_space=pltpu.MemorySpace.SMEM),    # blin scalar
        ],
        out_specs=pl.BlockSpec((BB, 1), lambda b: (b, 0)),
        scratch_shapes=[
            pltpu.VMEM((T, BB, H), jnp.float32),       # per-layer sequence
            pltpu.VMEM((T, BB, 4 * H), jnp.float32),   # hoisted input projection
        ],
        compiler_params=pltpu.CompilerParams(
            dimension_semantics=("parallel",)),        # batch shards across TCs
    )(x_pad, params["wih"], params["whh"], params["bias"],
      params["wlin"], params["blin"])
    return out[:B]


def _permute_gates_ifog(w):
    """Reorder last-axis gate blocks from PyTorch [i,f,g,o] to [i,f,o,g]."""
    H4 = w.shape[-1]
    H = H4 // 4
    return jnp.concatenate(
        [w[..., :2 * H], w[..., 3 * H:], w[..., 2 * H:3 * H]], axis=-1)


def init_params(key, n_features, seq_len, n_hidden, n_layers):
    """Deterministic PyTorch-style init (U[-1/sqrt(fan), 1/sqrt(fan)])."""
    H = n_hidden
    k_lstm = 1.0 / math.sqrt(H)
    keys = jax.random.split(key, 4 * n_layers + 2)
    wih_list, whh_list, b_list, raw = [], [], [], []
    idx = 0
    for l in range(n_layers):
        in_dim = n_features if l == 0 else H
        w_ih = jax.random.uniform(keys[idx], (4 * H, in_dim),
                                  minval=-k_lstm, maxval=k_lstm); idx += 1
        w_hh = jax.random.uniform(keys[idx], (4 * H, H),
                                  minval=-k_lstm, maxval=k_lstm); idx += 1
        b_ih = jax.random.uniform(keys[idx], (4 * H,),
                                  minval=-k_lstm, maxval=k_lstm); idx += 1
        b_hh = jax.random.uniform(keys[idx], (4 * H,),
                                  minval=-k_lstm, maxval=k_lstm); idx += 1
        raw.append((w_ih, w_hh, b_ih, b_hh))
        w_ih_t = jnp.zeros((H, 4 * H), jnp.float32).at[:in_dim, :].set(w_ih.T)
        wih_list.append(_permute_gates_ifog(w_ih_t))
        whh_list.append(_permute_gates_ifog(w_hh.T))
        b_list.append(_permute_gates_ifog(b_ih + b_hh)[None, :])
    k_lin = 1.0 / math.sqrt(H * seq_len)
    w_lin = jax.random.uniform(keys[idx], (1, H * seq_len),
                               minval=-k_lin, maxval=k_lin); idx += 1
    b_lin = jax.random.uniform(keys[idx], (1,), minval=-k_lin, maxval=k_lin)
    params = dict(
        wih=jnp.stack(wih_list).astype(jnp.bfloat16),     # MXU operands in bf16
        whh=jnp.stack(whh_list).astype(jnp.bfloat16),
        bias=jnp.stack(b_list).astype(jnp.float32),
        wlin=w_lin.reshape(seq_len, 1, H).astype(jnp.float32),
        blin=b_lin.reshape(1, 1).astype(jnp.float32),
    )
    return params, raw, (w_lin, b_lin)


def ref_forward(x, raw, lin, n_hidden, n_layers, *, bf16_matmuls=False):
    """Pure-JAX reference replicating torch.nn.LSTM + Linear (eval mode).

    With bf16_matmuls=True it mirrors the kernel's mixed precision (bf16
    matmul operands, f32 accumulate/elementwise) for a tight check.
    """
    B, T, _ = x.shape
    H = n_hidden
    inp = x.astype(jnp.float32)
    for l in range(n_layers):
        w_ih, w_hh, b_ih, b_hh = raw[l]
        if bf16_matmuls:
            w_ih_m = w_ih.T.astype(jnp.bfloat16)
            w_hh_m = w_hh.T.astype(jnp.bfloat16)
        else:
            w_ih_m = w_ih.T
            w_hh_m = w_hh.T
        bias = (b_ih + b_hh).astype(jnp.float32)
        h = jnp.zeros((B, H), jnp.float32)
        c = jnp.zeros((B, H), jnp.float32)
        outs = []
        for t in range(T):
            x_t = inp[:, t, :]
            if bf16_matmuls:
                x_t = x_t.astype(jnp.bfloat16)
                h_in = h.astype(jnp.bfloat16)
            else:
                h_in = h
            pre = (jnp.dot(x_t, w_ih_m, preferred_element_type=jnp.float32)
                   + jnp.dot(h_in, w_hh_m, preferred_element_type=jnp.float32)
                   + bias)
            i = jax.nn.sigmoid(pre[:, 0:H])
            f = jax.nn.sigmoid(pre[:, H:2 * H])
            g = jnp.tanh(pre[:, 2 * H:3 * H])
            o = jax.nn.sigmoid(pre[:, 3 * H:4 * H])
            c = f * c + i * g
            h = o * jnp.tanh(c)
            outs.append(h)
        inp = jnp.stack(outs, axis=1)       # (B, T, H)
    flat = inp.reshape(B, T * H)
    w_lin, b_lin = lin
    return flat @ w_lin.T + b_lin[None, :]


if __name__ == "__main__":
    # Module config (matches MV_LSTM(n_features, seq_length, n_hidden, n_layers, dropout))
    n_features, seq_len, n_hidden, n_layers = 4, 8, 32, 2
    batch = 2

    key = jax.random.PRNGKey(0)
    k_param, k_x = jax.random.split(key)
    params, raw, lin = init_params(k_param, n_features, seq_len, n_hidden, n_layers)

    x = jax.random.normal(k_x, (batch, seq_len, n_features), dtype=jnp.float32)

    out = mv_lstm_forward(x, params, n_hidden)
    out = jax.block_until_ready(out)
    assert out.shape == (batch, 1)

    # Tight check vs a reference that mirrors the kernel's bf16-matmul precision.
    ref_bf16 = ref_forward(x, raw, lin, n_hidden, n_layers, bf16_matmuls=True)
    if not jnp.allclose(out, ref_bf16, rtol=2e-3, atol=2e-3):
        raise AssertionError(f"mismatch vs bf16 mirror: kernel={out} ref={ref_bf16}")

    # Looser fidelity check vs the full-f32 PyTorch-equivalent reference
    # (bf16 matmul operands accumulate rounding over the T*L recurrence).
    ref_f32 = ref_forward(x, raw, lin, n_hidden, n_layers, bf16_matmuls=False)
    if not jnp.allclose(out, ref_f32, rtol=5e-2, atol=5e-2):
        raise AssertionError(f"mismatch vs f32 ref: kernel={out} ref={ref_f32}")

    print("KERNEL_OK")
</pallas_src>

<mosaic_0001>
module attributes {stable_mosaic.version = 11 : i64} {
  func.func @mv_lstm_kernel(%arg0: i32, %arg1: memref<8x8x32xf32, #tpu.memory_space<vmem>>, %arg2: memref<2x32x128xbf16, #tpu.memory_space<vmem>>, %arg3: memref<2x32x128xbf16, #tpu.memory_space<vmem>>, %arg4: memref<2x1x128xf32, #tpu.memory_space<vmem>>, %arg5: memref<8x1x32xf32, #tpu.memory_space<vmem>>, %arg6: memref<1x1xf32, #tpu.memory_space<smem>>, %arg7: memref<8x1xf32, #tpu.memory_space<vmem>>, %arg8: memref<8x8x32xf32, #tpu.memory_space<vmem>>, %arg9: memref<8x8x128xf32, #tpu.memory_space<vmem>>) attributes {dimension_semantics = [#tpu.dimension_semantics<parallel>], iteration_bounds = array<i64: 1>, scalar_prefetch = 0 : i64, scratch_operands = 2 : i64, tpu.core_type = #tpu.core_type<tc>, window_params = [{transform_indices = @transform_0, window_bounds = array<i64: 8, 8, 32>}, {pipeline_mode = #tpu.pipeline_mode<synchronous>, transform_indices = @transform_1, window_bounds = array<i64: 2, 32, 128>}, {pipeline_mode = #tpu.pipeline_mode<synchronous>, transform_indices = @transform_2, window_bounds = array<i64: 2, 32, 128>}, {pipeline_mode = #tpu.pipeline_mode<synchronous>, transform_indices = @transform_3, window_bounds = array<i64: 2, 1, 128>}, {pipeline_mode = #tpu.pipeline_mode<synchronous>, transform_indices = @transform_4, window_bounds = array<i64: 8, 1, 32>}, {transform_indices = @transform_5, window_bounds = array<i64: 1, 1>}, {transform_indices = @transform_6, window_bounds = array<i64: 8, 1>}]} {
    %c0 = arith.constant 0 : index
    %c0_0 = arith.constant 0 : index
    %c0_1 = arith.constant 0 : index
    %0 = vector.load %arg2[%c0, %c0_0, %c0_1] : memref<2x32x128xbf16, #tpu.memory_space<vmem>>, vector<1x32x128xbf16>
    %1 = vector.shape_cast %0 : vector<1x32x128xbf16> to vector<32x128xbf16>
    %c0_2 = arith.constant 0 : index
    %c0_3 = arith.constant 0 : index
    %c0_4 = arith.constant 0 : index
    %2 = vector.load %arg3[%c0_2, %c0_3, %c0_4] : memref<2x32x128xbf16, #tpu.memory_space<vmem>>, vector<1x32x128xbf16>
    %3 = vector.shape_cast %2 : vector<1x32x128xbf16> to vector<32x128xbf16>
    %c0_5 = arith.constant 0 : index
    %c0_6 = arith.constant 0 : index
    %c0_7 = arith.constant 0 : index
    %4 = vector.load %arg4[%c0_5, %c0_6, %c0_7] : memref<2x1x128xf32, #tpu.memory_space<vmem>>, vector<1x1x128xf32>
    %5 = vector.shape_cast %4 : vector<1x1x128xf32> to vector<1x128xf32>
    %c0_8 = arith.constant 0 : index
    %c0_9 = arith.constant 0 : index
    %c0_10 = arith.constant 0 : index
    %6 = vector.load %arg1[%c0_8, %c0_9, %c0_10] : memref<8x8x32xf32, #tpu.memory_space<vmem>>, vector<8x8x32xf32>
    %7 = vector.shape_cast %6 : vector<8x8x32xf32> to vector<64x32xf32>
    %8 = arith.truncf %7 : vector<64x32xf32> to vector<64x32xbf16>
    %cst = arith.constant dense<0.000000e+00> : vector<64x128xf32>
    %9 = tpu.matmul %8, %1, %cst {dimension_numbers = #tpu.dot_dimension_numbers<[1], [0], [0], [1], [0, 0, 1, 1], [], []>} : vector<64x32xbf16>, vector<32x128xbf16>, vector<64x128xf32> -> vector<64x128xf32>
    %10 = vector.broadcast %5 : vector<1x128xf32> to vector<64x128xf32>
    %11 = arith.addf %9, %10 : vector<64x128xf32>
    %12 = vector.shape_cast %11 : vector<64x128xf32> to vector<8x8x128xf32>
    %c0_11 = arith.constant 0 : index
    %c0_12 = arith.constant 0 : index
    %c0_13 = arith.constant 0 : index
    %13 = vector.load %arg9[%c0_11, %c0_12, %c0_13] : memref<8x8x128xf32, #tpu.memory_space<vmem>>, vector<8x8x128xf32>
    tpu.vector_store %arg9[%c0_11, %c0_12, %c0_13], %12 {strides = array<i32>} : memref<8x8x128xf32, #tpu.memory_space<vmem>>, vector<8x8x128xf32>,
    %cst_14 = arith.constant 0.000000e+00 : f32
    %14 = vector.broadcast %cst_14 : f32 to vector<8x32xf32>
    %cst_15 = arith.constant 0.000000e+00 : f32
    %15 = vector.broadcast %cst_15 : f32 to vector<8x32xf32>
    %c0_i32 = arith.constant 0 : i32
    %16 = arith.index_cast %c0_i32 : i32 to index
    %c0_16 = arith.constant 0 : index
    %c0_17 = arith.constant 0 : index
    %17 = vector.load %arg9[%16, %c0_16, %c0_17] : memref<8x8x128xf32, #tpu.memory_space<vmem>>, vector<1x8x128xf32>
    %18 = vector.shape_cast %17 : vector<1x8x128xf32> to vector<8x128xf32>
    %19 = arith.truncf %14 : vector<8x32xf32> to vector<8x32xbf16>
    %cst_18 = arith.constant dense<0.000000e+00> : vector<8x128xf32>
    %20 = tpu.matmul %19, %3, %cst_18 {dimension_numbers = #tpu.dot_dimension_numbers<[1], [0], [0], [1], [0, 0, 1, 1], [], []>} : vector<8x32xbf16>, vector<32x128xbf16>, vector<8x128xf32> -> vector<8x128xf32>
    %21 = arith.addf %18, %20 : vector<8x128xf32>
    %22 = vector.extract_strided_slice %21 {offsets = [0, 0], sizes = [8, 96], strides = [1, 1]} : vector<8x128xf32> to vector<8x96xf32>
    %23 = arith.negf %22 : vector<8x96xf32>
    %24 = math.exp %23 : vector<8x96xf32>
    %cst_19 = arith.constant 1.000000e+00 : f32
    %25 = vector.broadcast %cst_19 : f32 to vector<8x96xf32>
    %26 = arith.addf %25, %24 : vector<8x96xf32>
    %27 = arith.divf %25, %26 : vector<8x96xf32>
    %28 = vector.extract_strided_slice %27 {offsets = [0, 0], sizes = [8, 32], strides = [1, 1]} : vector<8x96xf32> to vector<8x32xf32>
    %29 = vector.extract_strided_slice %27 {offsets = [0, 32], sizes = [8, 32], strides = [1, 1]} : vector<8x96xf32> to vector<8x32xf32>
    %30 = vector.extract_strided_slice %27 {offsets = [0, 64], sizes = [8, 32], strides = [1, 1]} : vector<8x96xf32> to vector<8x32xf32>
    %31 = vector.extract_strided_slice %21 {offsets = [0, 96], sizes = [8, 32], strides = [1, 1]} : vector<8x128xf32> to vector<8x32xf32>
    %32 = math.tanh %31 : vector<8x32xf32>
    %33 = arith.mulf %29, %15 : vector<8x32xf32>
    %34 = arith.mulf %28, %32 : vector<8x32xf32>
    %35 = arith.addf %33, %34 : vector<8x32xf32>
    %36 = math.tanh %35 : vector<8x32xf32>
    %37 = arith.mulf %30, %36 : vector<8x32xf32>
    %38 = arith.index_cast %c0_i32 : i32 to index
    %c0_20 = arith.constant 0 : index
    %c0_21 = arith.constant 0 : index
    %39 = vector.load %arg8[%38, %c0_20, %c0_21] : memref<8x8x32xf32, #tpu.memory_space<vmem>>, vector<1x8x32xf32>
    %40 = vector.shape_cast %39 : vector<1x8x32xf32> to vector<8x32xf32>
    %41 = vector.shape_cast %37 : vector<8x32xf32> to vector<1x8x32xf32>
    tpu.vector_store %arg8[%38, %c0_20, %c0_21], %41 {strides = array<i32>} : memref<8x8x32xf32, #tpu.memory_space<vmem>>, vector<1x8x32xf32>,
    %c1_i32 = arith.constant 1 : i32
    %42 = arith.index_cast %c1_i32 : i32 to index
    %c0_22 = arith.constant 0 : index
    %c0_23 = arith.constant 0 : index
    %43 = vector.load %arg9[%42, %c0_22, %c0_23] : memref<8x8x128xf32, #tpu.memory_space<vmem>>, vector<1x8x128xf32>
    %44 = vector.shape_cast %43 : vector<1x8x128xf32> to vector<8x128xf32>
    %45 = arith.truncf %37 : vector<8x32xf32> to vector<8x32xbf16>
    %cst_24 = arith.constant dense<0.000000e+00> : vector<8x128xf32>
    %46 = tpu.matmul %45, %3, %cst_24 {dimension_numbers = #tpu.dot_dimension_numbers<[1], [0], [0], [1], [0, 0, 1, 1], [], []>} : vector<8x32xbf16>, vector<32x128xbf16>, vector<8x128xf32> -> vector<8x128xf32>
    %47 = arith.addf %44, %46 : vector<8x128xf32>
    %48 = vector.extract_strided_slice %47 {offsets = [0, 0], sizes = [8, 96], strides = [1, 1]} : vector<8x128xf32> to vector<8x96xf32>
    %49 = arith.negf %48 : vector<8x96xf32>
    %50 = math.exp %49 : vector<8x96xf32>
    %cst_25 = arith.constant 1.000000e+00 : f32
    %51 = vector.broadcast %cst_25 : f32 to vector<8x96xf32>
    %52 = arith.addf %51, %50 : vector<8x96xf32>
    %53 = arith.divf %51, %52 : vector<8x96xf32>
    %54 = vector.extract_strided_slice %53 {offsets = [0, 0], sizes = [8, 32], strides = [1, 1]} : vector<8x96xf32> to vector<8x32xf32>
    %55 = vector.extract_strided_slice %53 {offsets = [0, 32], sizes = [8, 32], strides = [1, 1]} : vector<8x96xf32> to vector<8x32xf32>
    %56 = vector.extract_strided_slice %53 {offsets = [0, 64], sizes = [8, 32], strides = [1, 1]} : vector<8x96xf32> to vector<8x32xf32>
    %57 = vector.extract_strided_slice %47 {offsets = [0, 96], sizes = [8, 32], strides = [1, 1]} : vector<8x128xf32> to vector<8x32xf32>
    %58 = math.tanh %57 : vector<8x32xf32>
    %59 = arith.mulf %55, %35 : vector<8x32xf32>
    %60 = arith.mulf %54, %58 : vector<8x32xf32>
    %61 = arith.addf %59, %60 : vector<8x32xf32>
    %62 = math.tanh %61 : vector<8x32xf32>
    %63 = arith.mulf %56, %62 : vector<8x32xf32>
    %64 = arith.index_cast %c1_i32 : i32 to index
    %c0_26 = arith.constant 0 : index
    %c0_27 = arith.constant 0 : index
    %65 = vector.load %arg8[%64, %c0_26, %c0_27] : memref<8x8x32xf32, #tpu.memory_space<vmem>>, vector<1x8x32xf32>
    %66 = vector.shape_cast %65 : vector<1x8x32xf32> to vector<8x32xf32>
    %67 = vector.shape_cast %63 : vector<8x32xf32> to vector<1x8x32xf32>
    tpu.vector_store %arg8[%64, %c0_26, %c0_27], %67 {strides = array<i32>} : memref<8x8x32xf32, #tpu.memory_space<vmem>>, vector<1x8x32xf32>,
    %c2_i32 = arith.constant 2 : i32
    %68 = arith.index_cast %c2_i32 : i32 to index
    %c0_28 = arith.constant 0 : index
    %c0_29 = arith.constant 0 : index
    %69 = vector.load %arg9[%68, %c0_28, %c0_29] : memref<8x8x128xf32, #tpu.memory_space<vmem>>, vector<1x8x128xf32>
    %70 = vector.shape_cast %69 : vector<1x8x128xf32> to vector<8x128xf32>
    %71 = arith.truncf %63 : vector<8x32xf32> to vector<8x32xbf16>
    %cst_30 = arith.constant dense<0.000000e+00> : vector<8x128xf32>
    %72 = tpu.matmul %71, %3, %cst_30 {dimension_numbers = #tpu.dot_dimension_numbers<[1], [0], [0], [1], [0, 0, 1, 1], [], []>} : vector<8x32xbf16>, vector<32x128xbf16>, vector<8x128xf32> -> vector<8x128xf32>
    %73 = arith.addf %70, %72 : vector<8x128xf32>
    %74 = vector.extract_strided_slice %73 {offsets = [0, 0], sizes = [8, 96], strides = [1, 1]} : vector<8x128xf32> to vector<8x96xf32>
    %75 = arith.negf %74 : vector<8x96xf32>
    %76 = math.exp %75 : vector<8x96xf32>
    %cst_31 = arith.constant 1.000000e+00 : f32
    %77 = vector.broadcast %cst_31 : f32 to vector<8x96xf32>
    %78 = arith.addf %77, %76 : vector<8x96xf32>
    %79 = arith.divf %77, %78 : vector<8x96xf32>
    %80 = vector.extract_strided_slice %79 {offsets = [0, 0], sizes = [8, 32], strides = [1, 1]} : vector<8x96xf32> to vector<8x32xf32>
    %81 = vector.extract_strided_slice %79 {offsets = [0, 32], sizes = [8, 32], strides = [1, 1]} : vector<8x96xf32> to vector<8x32xf32>
    %82 = vector.extract_strided_slice %79 {offsets = [0, 64], sizes = [8, 32], strides = [1, 1]} : vector<8x96xf32> to vector<8x32xf32>
    %83 = vector.extract_strided_slice %73 {offsets = [0, 96], sizes = [8, 32], strides = [1, 1]} : vector<8x128xf32> to vector<8x32xf32>
    %84 = math.tanh %83 : vector<8x32xf32>
    %85 = arith.mulf %81, %61 : vector<8x32xf32>
    %86 = arith.mulf %80, %84 : vector<8x32xf32>
    %87 = arith.addf %85, %86 : vector<8x32xf32>
    %88 = math.tanh %87 : vector<8x32xf32>
    %89 = arith.mulf %82, %88 : vector<8x32xf32>
    %90 = arith.index_cast %c2_i32 : i32 to index
    %c0_32 = arith.constant 0 : index
    %c0_33 = arith.constant 0 : index
    %91 = vector.load %arg8[%90, %c0_32, %c0_33] : memref<8x8x32xf32, #tpu.memory_space<vmem>>, vector<1x8x32xf32>
    %92 = vector.shape_cast %91 : vector<1x8x32xf32> to vector<8x32xf32>
    %93 = vector.shape_cast %89 : vector<8x32xf32> to vector<1x8x32xf32>
    tpu.vector_store %arg8[%90, %c0_32, %c0_33], %93 {strides = array<i32>} : memref<8x8x32xf32, #tpu.memory_space<vmem>>, vector<1x8x32xf32>,
    %c3_i32 = arith.constant 3 : i32
    %94 = arith.index_cast %c3_i32 : i32 to index
    %c0_34 = arith.constant 0 : index
    %c0_35 = arith.constant 0 : index
    %95 = vector.load %arg9[%94, %c0_34, %c0_35] : memref<8x8x128xf32, #tpu.memory_space<vmem>>, vector<1x8x128xf32>
    %96 = vector.shape_cast %95 : vector<1x8x128xf32> to vector<8x128xf32>
    %97 = arith.truncf %89 : vector<8x32xf32> to vector<8x32xbf16>
    %cst_36 = arith.constant dense<0.000000e+00> : vector<8x128xf32>
    %98 = tpu.matmul %97, %3, %cst_36 {dimension_numbers = #tpu.dot_dimension_numbers<[1], [0], [0], [1], [0, 0, 1, 1], [], []>} : vector<8x32xbf16>, vector<32x128xbf16>, vector<8x128xf32> -> vector<8x128xf32>
    %99 = arith.addf %96, %98 : vector<8x128xf32>
    %100 = vector.extract_strided_slice %99 {offsets = [0, 0], sizes = [8, 96], strides = [1, 1]} : vector<8x128xf32> to vector<8x96xf32>
    %101 = arith.negf %100 : vector<8x96xf32>
    %102 = math.exp %101 : vector<8x96xf32>
    %cst_37 = arith.constant 1.000000e+00 : f32
    %103 = vector.broadcast %cst_37 : f32 to vector<8x96xf32>
    %104 = arith.addf %103, %102 : vector<8x96xf32>
    %105 = arith.divf %103, %104 : vector<8x96xf32>
    %106 = vector.extract_strided_slice %105 {offsets = [0, 0], sizes = [8, 32], strides = [1, 1]} : vector<8x96xf32> to vector<8x32xf32>
    %107 = vector.extract_strided_slice %105 {offsets = [0, 32], sizes = [8, 32], strides = [1, 1]} : vector<8x96xf32> to vector<8x32xf32>
    %108 = vector.extract_strided_slice %105 {offsets = [0, 64], sizes = [8, 32], strides = [1, 1]} : vector<8x96xf32> to vector<8x32xf32>
    %109 = vector.extract_strided_slice %99 {offsets = [0, 96], sizes = [8, 32], strides = [1, 1]} : vector<8x128xf32> to vector<8x32xf32>
    %110 = math.tanh %109 : vector<8x32xf32>
    %111 = arith.mulf %107, %87 : vector<8x32xf32>
    %112 = arith.mulf %106, %110 : vector<8x32xf32>
    %113 = arith.addf %111, %112 : vector<8x32xf32>
    %114 = math.tanh %113 : vector<8x32xf32>
    %115 = arith.mulf %108, %114 : vector<8x32xf32>
    %116 = arith.index_cast %c3_i32 : i32 to index
    %c0_38 = arith.constant 0 : index
    %c0_39 = arith.constant 0 : index
    %117 = vector.load %arg8[%116, %c0_38, %c0_39] : memref<8x8x32xf32, #tpu.memory_space<vmem>>, vector<1x8x32xf32>
    %118 = vector.shape_cast %117 : vector<1x8x32xf32> to vector<8x32xf32>
    %119 = vector.shape_cast %115 : vector<8x32xf32> to vector<1x8x32xf32>
    tpu.vector_store %arg8[%116, %c0_38, %c0_39], %119 {strides = array<i32>} : memref<8x8x32xf32, #tpu.memory_space<vmem>>, vector<1x8x32xf32>,
    %c4_i32 = arith.constant 4 : i32
    %120 = arith.index_cast %c4_i32 : i32 to index
    %c0_40 = arith.constant 0 : index
    %c0_41 = arith.constant 0 : index
    %121 = vector.load %arg9[%120, %c0_40, %c0_41] : memref<8x8x128xf32, #tpu.memory_space<vmem>>, vector<1x8x128xf32>
    %122 = vector.shape_cast %121 : vector<1x8x128xf32> to vector<8x128xf32>
    %123 = arith.truncf %115 : vector<8x32xf32> to vector<8x32xbf16>
    %cst_42 = arith.constant dense<0.000000e+00> : vector<8x128xf32>
    %124 = tpu.matmul %123, %3, %cst_42 {dimension_numbers = #tpu.dot_dimension_numbers<[1], [0], [0], [1], [0, 0, 1, 1], [], []>} : vector<8x32xbf16>, vector<32x128xbf16>, vector<8x128xf32> -> vector<8x128xf32>
    %125 = arith.addf %122, %124 : vector<8x128xf32>
    %126 = vector.extract_strided_slice %125 {offsets = [0, 0], sizes = [8, 96], strides = [1, 1]} : vector<8x128xf32> to vector<8x96xf32>
    %127 = arith.negf %126 : vector<8x96xf32>
    %128 = math.exp %127 : vector<8x96xf32>
    %cst_43 = arith.constant 1.000000e+00 : f32
    %129 = vector.broadcast %cst_43 : f32 to vector<8x96xf32>
    %130 = arith.addf %129, %128 : vector<8x96xf32>
    %131 = arith.divf %129, %130 : vector<8x96xf32>
    %132 = vector.extract_strided_slice %131 {offsets = [0, 0], sizes = [8, 32], strides = [1, 1]} : vector<8x96xf32> to vector<8x32xf32>
    %133 = vector.extract_strided_slice %131 {offsets = [0, 32], sizes = [8, 32], strides = [1, 1]} : vector<8x96xf32> to vector<8x32xf32>
    %134 = vector.extract_strided_slice %131 {offsets = [0, 64], sizes = [8, 32], strides = [1, 1]} : vector<8x96xf32> to vector<8x32xf32>
    %135 = vector.extract_strided_slice %125 {offsets = [0, 96], sizes = [8, 32], strides = [1, 1]} : vector<8x128xf32> to vector<8x32xf32>
    %136 = math.tanh %135 : vector<8x32xf32>
    %137 = arith.mulf %133, %113 : vector<8x32xf32>
    %138 = arith.mulf %132, %136 : vector<8x32xf32>
    %139 = arith.addf %137, %138 : vector<8x32xf32>
    %140 = math.tanh %139 : vector<8x32xf32>
    %141 = arith.mulf %134, %140 : vector<8x32xf32>
    %142 = arith.index_cast %c4_i32 : i32 to index
    %c0_44 = arith.constant 0 : index
    %c0_45 = arith.constant 0 : index
    %143 = vector.load %arg8[%142, %c0_44, %c0_45] : memref<8x8x32xf32, #tpu.memory_space<vmem>>, vector<1x8x32xf32>
    %144 = vector.shape_cast %143 : vector<1x8x32xf32> to vector<8x32xf32>
    %145 = vector.shape_cast %141 : vector<8x32xf32> to vector<1x8x32xf32>
    tpu.vector_store %arg8[%142, %c0_44, %c0_45], %145 {strides = array<i32>} : memref<8x8x32xf32, #tpu.memory_space<vmem>>, vector<1x8x32xf32>,
    %c5_i32 = arith.constant 5 : i32
    %146 = arith.index_cast %c5_i32 : i32 to index
    %c0_46 = arith.constant 0 : index
    %c0_47 = arith.constant 0 : index
    %147 = vector.load %arg9[%146, %c0_46, %c0_47] : memref<8x8x128xf32, #tpu.memory_space<vmem>>, vector<1x8x128xf32>
    %148 = vector.shape_cast %147 : vector<1x8x128xf32> to vector<8x128xf32>
    %149 = arith.truncf %141 : vector<8x32xf32> to vector<8x32xbf16>
    %cst_48 = arith.constant dense<0.000000e+00> : vector<8x128xf32>
    %150 = tpu.matmul %149, %3, %cst_48 {dimension_numbers = #tpu.dot_dimension_numbers<[1], [0], [0], [1], [0, 0, 1, 1], [], []>} : vector<8x32xbf16>, vector<32x128xbf16>, vector<8x128xf32> -> vector<8x128xf32>
    %151 = arith.addf %148, %150 : vector<8x128xf32>
    %152 = vector.extract_strided_slice %151 {offsets = [0, 0], sizes = [8, 96], strides = [1, 1]} : vector<8x128xf32> to vector<8x96xf32>
    %153 = arith.negf %152 : vector<8x96xf32>
    %154 = math.exp %153 : vector<8x96xf32>
    %cst_49 = arith.constant 1.000000e+00 : f32
    %155 = vector.broadcast %cst_49 : f32 to vector<8x96xf32>
    %156 = arith.addf %155, %154 : vector<8x96xf32>
    %157 = arith.divf %155, %156 : vector<8x96xf32>
    %158 = vector.extract_strided_slice %157 {offsets = [0, 0], sizes = [8, 32], strides = [1, 1]} : vector<8x96xf32> to vector<8x32xf32>
    %159 = vector.extract_strided_slice %157 {offsets = [0, 32], sizes = [8, 32], strides = [1, 1]} : vector<8x96xf32> to vector<8x32xf32>
    %160 = vector.extract_strided_slice %157 {offsets = [0, 64], sizes = [8, 32], strides = [1, 1]} : vector<8x96xf32> to vector<8x32xf32>
    %161 = vector.extract_strided_slice %151 {offsets = [0, 96], sizes = [8, 32], strides = [1, 1]} : vector<8x128xf32> to vector<8x32xf32>
    %162 = math.tanh %161 : vector<8x32xf32>
    %163 = arith.mulf %159, %139 : vector<8x32xf32>
    %164 = arith.mulf %158, %162 : vector<8x32xf32>
    %165 = arith.addf %163, %164 : vector<8x32xf32>
    %166 = math.tanh %165 : vector<8x32xf32>
    %167 = arith.mulf %160, %166 : vector<8x32xf32>
    %168 = arith.index_cast %c5_i32 : i32 to index
    %c0_50 = arith.constant 0 : index
    %c0_51 = arith.constant 0 : index
    %169 = vector.load %arg8[%168, %c0_50, %c0_51] : memref<8x8x32xf32, #tpu.memory_space<vmem>>, vector<1x8x32xf32>
    %170 = vector.shape_cast %169 : vector<1x8x32xf32> to vector<8x32xf32>
    %171 = vector.shape_cast %167 : vector<8x32xf32> to vector<1x8x32xf32>
    tpu.vector_store %arg8[%168, %c0_50, %c0_51], %171 {strides = array<i32>} : memref<8x8x32xf32, #tpu.memory_space<vmem>>, vector<1x8x32xf32>,
    %c6_i32 = arith.constant 6 : i32
    %172 = arith.index_cast %c6_i32 : i32 to index
    %c0_52 = arith.constant 0 : index
    %c0_53 = arith.constant 0 : index
    %173 = vector.load %arg9[%172, %c0_52, %c0_53] : memref<8x8x128xf32, #tpu.memory_space<vmem>>, vector<1x8x128xf32>
    %174 = vector.shape_cast %173 : vector<1x8x128xf32> to vector<8x128xf32>
    %175 = arith.truncf %167 : vector<8x32xf32> to vector<8x32xbf16>
    %cst_54 = arith.constant dense<0.000000e+00> : vector<8x128xf32>
    %176 = tpu.matmul %175, %3, %cst_54 {dimension_numbers = #tpu.dot_dimension_numbers<[1], [0], [0], [1], [0, 0, 1, 1], [], []>} : vector<8x32xbf16>, vector<32x128xbf16>, vector<8x128xf32> -> vector<8x128xf32>
    %177 = arith.addf %174, %176 : vector<8x128xf32>
    %178 = vector.extract_strided_slice %177 {offsets = [0, 0], sizes = [8, 96], strides = [1, 1]} : vector<8x128xf32> to vector<8x96xf32>
    %179 = arith.negf %178 : vector<8x96xf32>
    %180 = math.exp %179 : vector<8x96xf32>
    %cst_55 = arith.constant 1.000000e+00 : f32
    %181 = vector.broadcast %cst_55 : f32 to vector<8x96xf32>
    %182 = arith.addf %181, %180 : vector<8x96xf32>
    %183 = arith.divf %181, %182 : vector<8x96xf32>
    %184 = vector.extract_strided_slice %183 {offsets = [0, 0], sizes = [8, 32], strides = [1, 1]} : vector<8x96xf32> to vector<8x32xf32>
    %185 = vector.extract_strided_slice %183 {offsets = [0, 32], sizes = [8, 32], strides = [1, 1]} : vector<8x96xf32> to vector<8x32xf32>
    %186 = vector.extract_strided_slice %183 {offsets = [0, 64], sizes = [8, 32], strides = [1, 1]} : vector<8x96xf32> to vector<8x32xf32>
    %187 = vector.extract_strided_slice %177 {offsets = [0, 96], sizes = [8, 32], strides = [1, 1]} : vector<8x128xf32> to vector<8x32xf32>
    %188 = math.tanh %187 : vector<8x32xf32>
    %189 = arith.mulf %185, %165 : vector<8x32xf32>
    %190 = arith.mulf %184, %188 : vector<8x32xf32>
    %191 = arith.addf %189, %190 : vector<8x32xf32>
    %192 = math.tanh %191 : vector<8x32xf32>
    %193 = arith.mulf %186, %192 : vector<8x32xf32>
    %194 = arith.index_cast %c6_i32 : i32 to index
    %c0_56 = arith.constant 0 : index
    %c0_57 = arith.constant 0 : index
    %195 = vector.load %arg8[%194, %c0_56, %c0_57] : memref<8x8x32xf32, #tpu.memory_space<vmem>>, vector<1x8x32xf32>
    %196 = vector.shape_cast %195 : vector<1x8x32xf32> to vector<8x32xf32>
    %197 = vector.shape_cast %193 : vector<8x32xf32> to vector<1x8x32xf32>
    tpu.vector_store %arg8[%194, %c0_56, %c0_57], %197 {strides = array<i32>} : memref<8x8x32xf32, #tpu.memory_space<vmem>>, vector<1x8x32xf32>,
    %c7_i32 = arith.constant 7 : i32
    %198 = arith.index_cast %c7_i32 : i32 to index
    %c0_58 = arith.constant 0 : index
    %c0_59 = arith.constant 0 : index
    %199 = vector.load %arg9[%198, %c0_58, %c0_59] : memref<8x8x128xf32, #tpu.memory_space<vmem>>, vector<1x8x128xf32>
    %200 = vector.shape_cast %199 : vector<1x8x128xf32> to vector<8x128xf32>
    %201 = arith.truncf %193 : vector<8x32xf32> to vector<8x32xbf16>
    %cst_60 = arith.constant dense<0.000000e+00> : vector<8x128xf32>
    %202 = tpu.matmul %201, %3, %cst_60 {dimension_numbers = #tpu.dot_dimension_numbers<[1], [0], [0], [1], [0, 0, 1, 1], [], []>} : vector<8x32xbf16>, vector<32x128xbf16>, vector<8x128xf32> -> vector<8x128xf32>
    %203 = arith.addf %200, %202 : vector<8x128xf32>
    %204 = vector.extract_strided_slice %203 {offsets = [0, 0], sizes = [8, 96], strides = [1, 1]} : vector<8x128xf32> to vector<8x96xf32>
    %205 = arith.negf %204 : vector<8x96xf32>
    %206 = math.exp %205 : vector<8x96xf32>
    %cst_61 = arith.constant 1.000000e+00 : f32
    %207 = vector.broadcast %cst_61 : f32 to vector<8x96xf32>
    %208 = arith.addf %207, %206 : vector<8x96xf32>
    %209 = arith.divf %207, %208 : vector<8x96xf32>
    %210 = vector.extract_strided_slice %209 {offsets = [0, 0], sizes = [8, 32], strides = [1, 1]} : vector<8x96xf32> to vector<8x32xf32>
    %211 = vector.extract_strided_slice %209 {offsets = [0, 32], sizes = [8, 32], strides = [1, 1]} : vector<8x96xf32> to vector<8x32xf32>
    %212 = vector.extract_strided_slice %209 {offsets = [0, 64], sizes = [8, 32], strides = [1, 1]} : vector<8x96xf32> to vector<8x32xf32>
    %213 = vector.extract_strided_slice %203 {offsets = [0, 96], sizes = [8, 32], strides = [1, 1]} : vector<8x128xf32> to vector<8x32xf32>
    %214 = math.tanh %213 : vector<8x32xf32>
    %215 = arith.mulf %211, %191 : vector<8x32xf32>
    %216 = arith.mulf %210, %214 : vector<8x32xf32>
    %217 = arith.addf %215, %216 : vector<8x32xf32>
    %218 = math.tanh %217 : vector<8x32xf32>
    %219 = arith.mulf %212, %218 : vector<8x32xf32>
    %220 = arith.index_cast %c7_i32 : i32 to index
    %c0_62 = arith.constant 0 : index
    %c0_63 = arith.constant 0 : index
    %221 = vector.load %arg8[%220, %c0_62, %c0_63] : memref<8x8x32xf32, #tpu.memory_space<vmem>>, vector<1x8x32xf32>
    %222 = vector.shape_cast %221 : vector<1x8x32xf32> to vector<8x32xf32>
    %223 = vector.shape_cast %219 : vector<8x32xf32> to vector<1x8x32xf32>
    tpu.vector_store %arg8[%220, %c0_62, %c0_63], %223 {strides = array<i32>} : memref<8x8x32xf32, #tpu.memory_space<vmem>>, vector<1x8x32xf32>,
    %c8_i32 = arith.constant 8 : i32
    %c1 = arith.constant 1 : index
    %c0_64 = arith.constant 0 : index
    %c0_65 = arith.constant 0 : index
    %224 = vector.load %arg2[%c1, %c0_64, %c0_65] : memref<2x32x128xbf16, #tpu.memory_space<vmem>>, vector<1x32x128xbf16>
    %225 = vector.shape_cast %224 : vector<1x32x128xbf16> to vector<32x128xbf16>
    %c1_66 = arith.constant 1 : index
    %c0_67 = arith.constant 0 : index
    %c0_68 = arith.constant 0 : index
    %226 = vector.load %arg3[%c1_66, %c0_67, %c0_68] : memref<2x32x128xbf16, #tpu.memory_space<vmem>>, vector<1x32x128xbf16>
    %227 = vector.shape_cast %226 : vector<1x32x128xbf16> to vector<32x128xbf16>
    %c1_69 = arith.constant 1 : index
    %c0_70 = arith.constant 0 : index
    %c0_71 = arith.constant 0 : index
    %228 = vector.load %arg4[%c1_69, %c0_70, %c0_71] : memref<2x1x128xf32, #tpu.memory_space<vmem>>, vector<1x1x128xf32>
    %229 = vector.shape_cast %228 : vector<1x1x128xf32> to vector<1x128xf32>
    %c0_72 = arith.constant 0 : index
    %c0_73 = arith.constant 0 : index
    %c0_74 = arith.constant 0 : index
    %230 = vector.load %arg8[%c0_72, %c0_73, %c0_74] : memref<8x8x32xf32, #tpu.memory_space<vmem>>, vector<8x8x32xf32>
    %231 = vector.shape_cast %230 : vector<8x8x32xf32> to vector<64x32xf32>
    %232 = arith.truncf %231 : vector<64x32xf32> to vector<64x32xbf16>
    %cst_75 = arith.constant dense<0.000000e+00> : vector<64x128xf32>
    %233 = tpu.matmul %232, %225, %cst_75 {dimension_numbers = #tpu.dot_dimension_numbers<[1], [0], [0], [1], [0, 0, 1, 1], [], []>} : vector<64x32xbf16>, vector<32x128xbf16>, vector<64x128xf32> -> vector<64x128xf32>
    %234 = vector.broadcast %229 : vector<1x128xf32> to vector<64x128xf32>
    %235 = arith.addf %233, %234 : vector<64x128xf32>
    %236 = vector.shape_cast %235 : vector<64x128xf32> to vector<8x8x128xf32>
    %c0_76 = arith.constant 0 : index
    %c0_77 = arith.constant 0 : index
    %c0_78 = arith.constant 0 : index
    %237 = vector.load %arg9[%c0_76, %c0_77, %c0_78] : memref<8x8x128xf32, #tpu.memory_space<vmem>>, vector<8x8x128xf32>
    tpu.vector_store %arg9[%c0_76, %c0_77, %c0_78], %236 {strides = array<i32>} : memref<8x8x128xf32, #tpu.memory_space<vmem>>, vector<8x8x128xf32>,
    %cst_79 = arith.constant 0.000000e+00 : f32
    %238 = vector.broadcast %cst_79 : f32 to vector<8x32xf32>
    %cst_80 = arith.constant 0.000000e+00 : f32
    %239 = vector.broadcast %cst_80 : f32 to vector<8x32xf32>
    %c0_i32_81 = arith.constant 0 : i32
    %240 = arith.index_cast %c0_i32_81 : i32 to index
    %c0_82 = arith.constant 0 : index
    %c0_83 = arith.constant 0 : index
    %241 = vector.load %arg9[%240, %c0_82, %c0_83] : memref<8x8x128xf32, #tpu.memory_space<vmem>>, vector<1x8x128xf32>
    %242 = vector.shape_cast %241 : vector<1x8x128xf32> to vector<8x128xf32>
    %243 = arith.truncf %238 : vector<8x32xf32> to vector<8x32xbf16>
    %cst_84 = arith.constant dense<0.000000e+00> : vector<8x128xf32>
    %244 = tpu.matmul %243, %227, %cst_84 {dimension_numbers = #tpu.dot_dimension_numbers<[1], [0], [0], [1], [0, 0, 1, 1], [], []>} : vector<8x32xbf16>, vector<32x128xbf16>, vector<8x128xf32> -> vector<8x128xf32>
    %245 = arith.addf %242, %244 : vector<8x128xf32>
    %246 = vector.extract_strided_slice %245 {offsets = [0, 0], sizes = [8, 96], strides = [1, 1]} : vector<8x128xf32> to vector<8x96xf32>
    %247 = arith.negf %246 : vector<8x96xf32>
    %248 = math.exp %247 : vector<8x96xf32>
    %cst_85 = arith.constant 1.000000e+00 : f32
    %249 = vector.broadcast %cst_85 : f32 to vector<8x96xf32>
    %250 = arith.addf %249, %248 : vector<8x96xf32>
    %251 = arith.divf %249, %250 : vector<8x96xf32>
    %252 = vector.extract_strided_slice %251 {offsets = [0, 0], sizes = [8, 32], strides = [1, 1]} : vector<8x96xf32> to vector<8x32xf32>
    %253 = vector.extract_strided_slice %251 {offsets = [0, 32], sizes = [8, 32], strides = [1, 1]} : vector<8x96xf32> to vector<8x32xf32>
    %254 = vector.extract_strided_slice %251 {offsets = [0, 64], sizes = [8, 32], strides = [1, 1]} : vector<8x96xf32> to vector<8x32xf32>
    %255 = vector.extract_strided_slice %245 {offsets = [0, 96], sizes = [8, 32], strides = [1, 1]} : vector<8x128xf32> to vector<8x32xf32>
    %256 = math.tanh %255 : vector<8x32xf32>
    %257 = arith.mulf %253, %239 : vector<8x32xf32>
    %258 = arith.mulf %252, %256 : vector<8x32xf32>
    %259 = arith.addf %257, %258 : vector<8x32xf32>
    %260 = math.tanh %259 : vector<8x32xf32>
    %261 = arith.mulf %254, %260 : vector<8x32xf32>
    %262 = arith.index_cast %c0_i32_81 : i32 to index
    %c0_86 = arith.constant 0 : index
    %c0_87 = arith.constant 0 : index
    %263 = vector.load %arg8[%262, %c0_86, %c0_87] : memref<8x8x32xf32, #tpu.memory_space<vmem>>, vector<1x8x32xf32>
    %264 = vector.shape_cast %263 : vector<1x8x32xf32> to vector<8x32xf32>
    %265 = vector.shape_cast %261 : vector<8x32xf32> to vector<1x8x32xf32>
    tpu.vector_store %arg8[%262, %c0_86, %c0_87], %265 {strides = array<i32>} : memref<8x8x32xf32, #tpu.memory_space<vmem>>, vector<1x8x32xf32>,
    %c1_i32_88 = arith.constant 1 : i32
    %266 = arith.index_cast %c1_i32_88 : i32 to index
    %c0_89 = arith.constant 0 : index
    %c0_90 = arith.constant 0 : index
    %267 = vector.load %arg9[%266, %c0_89, %c0_90] : memref<8x8x128xf32, #tpu.memory_space<vmem>>, vector<1x8x128xf32>
    %268 = vector.shape_cast %267 : vector<1x8x128xf32> to vector<8x128xf32>
    %269 = arith.truncf %261 : vector<8x32xf32> to vector<8x32xbf16>
    %cst_91 = arith.constant dense<0.000000e+00> : vector<8x128xf32>
    %270 = tpu.matmul %269, %227, %cst_91 {dimension_numbers = #tpu.dot_dimension_numbers<[1], [0], [0], [1], [0, 0, 1, 1], [], []>} : vector<8x32xbf16>, vector<32x128xbf16>, vector<8x128xf32> -> vector<8x128xf32>
    %271 = arith.addf %268, %270 : vector<8x128xf32>
    %272 = vector.extract_strided_slice %271 {offsets = [0, 0], sizes = [8, 96], strides = [1, 1]} : vector<8x128xf32> to vector<8x96xf32>
    %273 = arith.negf %272 : vector<8x96xf32>
    %274 = math.exp %273 : vector<8x96xf32>
    %cst_92 = arith.constant 1.000000e+00 : f32
    %275 = vector.broadcast %cst_92 : f32 to vector<8x96xf32>
    %276 = arith.addf %275, %274 : vector<8x96xf32>
    %277 = arith.divf %275, %276 : vector<8x96xf32>
    %278 = vector.extract_strided_slice %277 {offsets = [0, 0], sizes = [8, 32], strides = [1, 1]} : vector<8x96xf32> to vector<8x32xf32>
    %279 = vector.extract_strided_slice %277 {offsets = [0, 32], sizes = [8, 32], strides = [1, 1]} : vector<8x96xf32> to vector<8x32xf32>
    %280 = vector.extract_strided_slice %277 {offsets = [0, 64], sizes = [8, 32], strides = [1, 1]} : vector<8x96xf32> to vector<8x32xf32>
    %281 = vector.extract_strided_slice %271 {offsets = [0, 96], sizes = [8, 32], strides = [1, 1]} : vector<8x128xf32> to vector<8x32xf32>
    %282 = math.tanh %281 : vector<8x32xf32>
    %283 = arith.mulf %279, %259 : vector<8x32xf32>
    %284 = arith.mulf %278, %282 : vector<8x32xf32>
    %285 = arith.addf %283, %284 : vector<8x32xf32>
    %286 = math.tanh %285 : vector<8x32xf32>
    %287 = arith.mulf %280, %286 : vector<8x32xf32>
    %288 = arith.index_cast %c1_i32_88 : i32 to index
    %c0_93 = arith.constant 0 : index
    %c0_94 = arith.constant 0 : index
    %289 = vector.load %arg8[%288, %c0_93, %c0_94] : memref<8x8x32xf32, #tpu.memory_space<vmem>>, vector<1x8x32xf32>
    %290 = vector.shape_cast %289 : vector<1x8x32xf32> to vector<8x32xf32>
    %291 = vector.shape_cast %287 : vector<8x32xf32> to vector<1x8x32xf32>
    tpu.vector_store %arg8[%288, %c0_93, %c0_94], %291 {strides = array<i32>} : memref<8x8x32xf32, #tpu.memory_space<vmem>>, vector<1x8x32xf32>,
    %c2_i32_95 = arith.constant 2 : i32
    %292 = arith.index_cast %c2_i32_95 : i32 to index
    %c0_96 = arith.constant 0 : index
    %c0_97 = arith.constant 0 : index
    %293 = vector.load %arg9[%292, %c0_96, %c0_97] : memref<8x8x128xf32, #tpu.memory_space<vmem>>, vector<1x8x128xf32>
    %294 = vector.shape_cast %293 : vector<1x8x128xf32> to vector<8x128xf32>
    %295 = arith.truncf %287 : vector<8x32xf32> to vector<8x32xbf16>
    %cst_98 = arith.constant dense<0.000000e+00> : vector<8x128xf32>
    %296 = tpu.matmul %295, %227, %cst_98 {dimension_numbers = #tpu.dot_dimension_numbers<[1], [0], [0], [1], [0, 0, 1, 1], [], []>} : vector<8x32xbf16>, vector<32x128xbf16>, vector<8x128xf32> -> vector<8x128xf32>
    %297 = arith.addf %294, %296 : vector<8x128xf32>
    %298 = vector.extract_strided_slice %297 {offsets = [0, 0], sizes = [8, 96], strides = [1, 1]} : vector<8x128xf32> to vector<8x96xf32>
    %299 = arith.negf %298 : vector<8x96xf32>
    %300 = math.exp %299 : vector<8x96xf32>
    %cst_99 = arith.constant 1.000000e+00 : f32
    %301 = vector.broadcast %cst_99 : f32 to vector<8x96xf32>
    %302 = arith.addf %301, %300 : vector<8x96xf32>
    %303 = arith.divf %301, %302 : vector<8x96xf32>
    %304 = vector.extract_strided_slice %303 {offsets = [0, 0], sizes = [8, 32], strides = [1, 1]} : vector<8x96xf32> to vector<8x32xf32>
    %305 = vector.extract_strided_slice %303 {offsets = [0, 32], sizes = [8, 32], strides = [1, 1]} : vector<8x96xf32> to vector<8x32xf32>
    %306 = vector.extract_strided_slice %303 {offsets = [0, 64], sizes = [8, 32], strides = [1, 1]} : vector<8x96xf32> to vector<8x32xf32>
    %307 = vector.extract_strided_slice %297 {offsets = [0, 96], sizes = [8, 32], strides = [1, 1]} : vector<8x128xf32> to vector<8x32xf32>
    %308 = math.tanh %307 : vector<8x32xf32>
    %309 = arith.mulf %305, %285 : vector<8x32xf32>
    %310 = arith.mulf %304, %308 : vector<8x32xf32>
    %311 = arith.addf %309, %310 : vector<8x32xf32>
    %312 = math.tanh %311 : vector<8x32xf32>
    %313 = arith.mulf %306, %312 : vector<8x32xf32>
    %314 = arith.index_cast %c2_i32_95 : i32 to index
    %c0_100 = arith.constant 0 : index
    %c0_101 = arith.constant 0 : index
    %315 = vector.load %arg8[%314, %c0_100, %c0_101] : memref<8x8x32xf32, #tpu.memory_space<vmem>>, vector<1x8x32xf32>
    %316 = vector.shape_cast %315 : vector<1x8x32xf32> to vector<8x32xf32>
    %317 = vector.shape_cast %313 : vector<8x32xf32> to vector<1x8x32xf32>
    tpu.vector_store %arg8[%314, %c0_100, %c0_101], %317 {strides = array<i32>} : memref<8x8x32xf32, #tpu.memory_space<vmem>>, vector<1x8x32xf32>,
    %c3_i32_102 = arith.constant 3 : i32
    %318 = arith.index_cast %c3_i32_102 : i32 to index
    %c0_103 = arith.constant 0 : index
    %c0_104 = arith.constant 0 : index
    %319 = vector.load %arg9[%318, %c0_103, %c0_104] : memref<8x8x128xf32, #tpu.memory_space<vmem>>, vector<1x8x128xf32>
    %320 = vector.shape_cast %319 : vector<1x8x128xf32> to vector<8x128xf32>
    %321 = arith.truncf %313 : vector<8x32xf32> to vector<8x32xbf16>
    %cst_105 = arith.constant dense<0.000000e+00> : vector<8x128xf32>
    %322 = tpu.matmul %321, %227, %cst_105 {dimension_numbers = #tpu.dot_dimension_numbers<[1], [0], [0], [1], [0, 0, 1, 1], [], []>} : vector<8x32xbf16>, vector<32x128xbf16>, vector<8x128xf32> -> vector<8x128xf32>
    %323 = arith.addf %320, %322 : vector<8x128xf32>
    %324 = vector.extract_strided_slice %323 {offsets = [0, 0], sizes = [8, 96], strides = [1, 1]} : vector<8x128xf32> to vector<8x96xf32>
    %325 = arith.negf %324 : vector<8x96xf32>
    %326 = math.exp %325 : vector<8x96xf32>
    %cst_106 = arith.constant 1.000000e+00 : f32
    %327 = vector.broadcast %cst_106 : f32 to vector<8x96xf32>
    %328 = arith.addf %327, %326 : vector<8x96xf32>
    %329 = arith.divf %327, %328 : vector<8x96xf32>
    %330 = vector.extract_strided_slice %329 {offsets = [0, 0], sizes = [8, 32], strides = [1, 1]} : vector<8x96xf32> to vector<8x32xf32>
    %331 = vector.extract_strided_slice %329 {offsets = [0, 32], sizes = [8, 32], strides = [1, 1]} : vector<8x96xf32> to vector<8x32xf32>
    %332 = vector.extract_strided_slice %329 {offsets = [0, 64], sizes = [8, 32], strides = [1, 1]} : vector<8x96xf32> to vector<8x32xf32>
    %333 = vector.extract_strided_slice %323 {offsets = [0, 96], sizes = [8, 32], strides = [1, 1]} : vector<8x128xf32> to vector<8x32xf32>
    %334 = math.tanh %333 : vector<8x32xf32>
    %335 = arith.mulf %331, %311 : vector<8x32xf32>
    %336 = arith.mulf %330, %334 : vector<8x32xf32>
    %337 = arith.addf %335, %336 : vector<8x32xf32>
    %338 = math.tanh %337 : vector<8x32xf32>
    %339 = arith.mulf %332, %338 : vector<8x32xf32>
    %340 = arith.index_cast %c3_i32_102 : i32 to index
    %c0_107 = arith.constant 0 : index
    %c0_108 = arith.constant 0 : index
    %341 = vector.load %arg8[%340, %c0_107, %c0_108] : memref<8x8x32xf32, #tpu.memory_space<vmem>>, vector<1x8x32xf32>
    %342 = vector.shape_cast %341 : vector<1x8x32xf32> to vector<8x32xf32>
    %343 = vector.shape_cast %339 : vector<8x32xf32> to vector<1x8x32xf32>
    tpu.vector_store %arg8[%340, %c0_107, %c0_108], %343 {strides = array<i32>} : memref<8x8x32xf32, #tpu.memory_space<vmem>>, vector<1x8x32xf32>,
    %c4_i32_109 = arith.constant 4 : i32
    %344 = arith.index_cast %c4_i32_109 : i32 to index
    %c0_110 = arith.constant 0 : index
    %c0_111 = arith.constant 0 : index
    %345 = vector.load %arg9[%344, %c0_110, %c0_111] : memref<8x8x128xf32, #tpu.memory_space<vmem>>, vector<1x8x128xf32>
    %346 = vector.shape_cast %345 : vector<1x8x128xf32> to vector<8x128xf32>
    %347 = arith.truncf %339 : vector<8x32xf32> to vector<8x32xbf16>
    %cst_112 = arith.constant dense<0.000000e+00> : vector<8x128xf32>
    %348 = tpu.matmul %347, %227, %cst_112 {dimension_numbers = #tpu.dot_dimension_numbers<[1], [0], [0], [1], [0, 0, 1, 1], [], []>} : vector<8x32xbf16>, vector<32x128xbf16>, vector<8x128xf32> -> vector<8x128xf32>
    %349 = arith.addf %346, %348 : vector<8x128xf32>
    %350 = vector.extract_strided_slice %349 {offsets = [0, 0], sizes = [8, 96], strides = [1, 1]} : vector<8x128xf32> to vector<8x96xf32>
    %351 = arith.negf %350 : vector<8x96xf32>
    %352 = math.exp %351 : vector<8x96xf32>
    %cst_113 = arith.constant 1.000000e+00 : f32
    %353 = vector.broadcast %cst_113 : f32 to vector<8x96xf32>
    %354 = arith.addf %353, %352 : vector<8x96xf32>
    %355 = arith.divf %353, %354 : vector<8x96xf32>
    %356 = vector.extract_strided_slice %355 {offsets = [0, 0], sizes = [8, 32], strides = [1, 1]} : vector<8x96xf32> to vector<8x32xf32>
    %357 = vector.extract_strided_slice %355 {offsets = [0, 32], sizes = [8, 32], strides = [1, 1]} : vector<8x96xf32> to vector<8x32xf32>
    %358 = vector.extract_strided_slice %355 {offsets = [0, 64], sizes = [8, 32], strides = [1, 1]} : vector<8x96xf32> to vector<8x32xf32>
    %359 = vector.extract_strided_slice %349 {offsets = [0, 96], sizes = [8, 32], strides = [1, 1]} : vector<8x128xf32> to vector<8x32xf32>
    %360 = math.tanh %359 : vector<8x32xf32>
    %361 = arith.mulf %357, %337 : vector<8x32xf32>
    %362 = arith.mulf %356, %360 : vector<8x32xf32>
    %363 = arith.addf %361, %362 : vector<8x32xf32>
    %364 = math.tanh %363 : vector<8x32xf32>
    %365 = arith.mulf %358, %364 : vector<8x32xf32>
    %366 = arith.index_cast %c4_i32_109 : i32 to index
    %c0_114 = arith.constant 0 : index
    %c0_115 = arith.constant 0 : index
    %367 = vector.load %arg8[%366, %c0_114, %c0_115] : memref<8x8x32xf32, #tpu.memory_space<vmem>>, vector<1x8x32xf32>
    %368 = vector.shape_cast %367 : vector<1x8x32xf32> to vector<8x32xf32>
    %369 = vector.shape_cast %365 : vector<8x32xf32> to vector<1x8x32xf32>
    tpu.vector_store %arg8[%366, %c0_114, %c0_115], %369 {strides = array<i32>} : memref<8x8x32xf32, #tpu.memory_space<vmem>>, vector<1x8x32xf32>,
    %c5_i32_116 = arith.constant 5 : i32
    %370 = arith.index_cast %c5_i32_116 : i32 to index
    %c0_117 = arith.constant 0 : index
    %c0_118 = arith.constant 0 : index
    %371 = vector.load %arg9[%370, %c0_117, %c0_118] : memref<8x8x128xf32, #tpu.memory_space<vmem>>, vector<1x8x128xf32>
    %372 = vector.shape_cast %371 : vector<1x8x128xf32> to vector<8x128xf32>
    %373 = arith.truncf %365 : vector<8x32xf32> to vector<8x32xbf16>
    %cst_119 = arith.constant dense<0.000000e+00> : vector<8x128xf32>
    %374 = tpu.matmul %373, %227, %cst_119 {dimension_numbers = #tpu.dot_dimension_numbers<[1], [0], [0], [1], [0, 0, 1, 1], [], []>} : vector<8x32xbf16>, vector<32x128xbf16>, vector<8x128xf32> -> vector<8x128xf32>
    %375 = arith.addf %372, %374 : vector<8x128xf32>
    %376 = vector.extract_strided_slice %375 {offsets = [0, 0], sizes = [8, 96], strides = [1, 1]} : vector<8x128xf32> to vector<8x96xf32>
    %377 = arith.negf %376 : vector<8x96xf32>
    %378 = math.exp %377 : vector<8x96xf32>
    %cst_120 = arith.constant 1.000000e+00 : f32
    %379 = vector.broadcast %cst_120 : f32 to vector<8x96xf32>
    %380 = arith.addf %379, %378 : vector<8x96xf32>
    %381 = arith.divf %379, %380 : vector<8x96xf32>
    %382 = vector.extract_strided_slice %381 {offsets = [0, 0], sizes = [8, 32], strides = [1, 1]} : vector<8x96xf32> to vector<8x32xf32>
    %383 = vector.extract_strided_slice %381 {offsets = [0, 32], sizes = [8, 32], strides = [1, 1]} : vector<8x96xf32> to vector<8x32xf32>
    %384 = vector.extract_strided_slice %381 {offsets = [0, 64], sizes = [8, 32], strides = [1, 1]} : vector<8x96xf32> to vector<8x32xf32>
    %385 = vector.extract_strided_slice %375 {offsets = [0, 96], sizes = [8, 32], strides = [1, 1]} : vector<8x128xf32> to vector<8x32xf32>
    %386 = math.tanh %385 : vector<8x32xf32>
    %387 = arith.mulf %383, %363 : vector<8x32xf32>
    %388 = arith.mulf %382, %386 : vector<8x32xf32>
    %389 = arith.addf %387, %388 : vector<8x32xf32>
    %390 = math.tanh %389 : vector<8x32xf32>
    %391 = arith.mulf %384, %390 : vector<8x32xf32>
    %392 = arith.index_cast %c5_i32_116 : i32 to index
    %c0_121 = arith.constant 0 : index
    %c0_122 = arith.constant 0 : index
    %393 = vector.load %arg8[%392, %c0_121, %c0_122] : memref<8x8x32xf32, #tpu.memory_space<vmem>>, vector<1x8x32xf32>
    %394 = vector.shape_cast %393 : vector<1x8x32xf32> to vector<8x32xf32>
    %395 = vector.shape_cast %391 : vector<8x32xf32> to vector<1x8x32xf32>
    tpu.vector_store %arg8[%392, %c0_121, %c0_122], %395 {strides = array<i32>} : memref<8x8x32xf32, #tpu.memory_space<vmem>>, vector<1x8x32xf32>,
    %c6_i32_123 = arith.constant 6 : i32
    %396 = arith.index_cast %c6_i32_123 : i32 to index
    %c0_124 = arith.constant 0 : index
    %c0_125 = arith.constant 0 : index
    %397 = vector.load %arg9[%396, %c0_124, %c0_125] : memref<8x8x128xf32, #tpu.memory_space<vmem>>, vector<1x8x128xf32>
    %398 = vector.shape_cast %397 : vector<1x8x128xf32> to vector<8x128xf32>
    %399 = arith.truncf %391 : vector<8x32xf32> to vector<8x32xbf16>
    %cst_126 = arith.constant dense<0.000000e+00> : vector<8x128xf32>
    %400 = tpu.matmul %399, %227, %cst_126 {dimension_numbers = #tpu.dot_dimension_numbers<[1], [0], [0], [1], [0, 0, 1, 1], [], []>} : vector<8x32xbf16>, vector<32x128xbf16>, vector<8x128xf32> -> vector<8x128xf32>
    %401 = arith.addf %398, %400 : vector<8x128xf32>
    %402 = vector.extract_strided_slice %401 {offsets = [0, 0], sizes = [8, 96], strides = [1, 1]} : vector<8x128xf32> to vector<8x96xf32>
    %403 = arith.negf %402 : vector<8x96xf32>
    %404 = math.exp %403 : vector<8x96xf32>
    %cst_127 = arith.constant 1.000000e+00 : f32
    %405 = vector.broadcast %cst_127 : f32 to vector<8x96xf32>
    %406 = arith.addf %405, %404 : vector<8x96xf32>
    %407 = arith.divf %405, %406 : vector<8x96xf32>
    %408 = vector.extract_strided_slice %407 {offsets = [0, 0], sizes = [8, 32], strides = [1, 1]} : vector<8x96xf32> to vector<8x32xf32>
    %409 = vector.extract_strided_slice %407 {offsets = [0, 32], sizes = [8, 32], strides = [1, 1]} : vector<8x96xf32> to vector<8x32xf32>
    %410 = vector.extract_strided_slice %407 {offsets = [0, 64], sizes = [8, 32], strides = [1, 1]} : vector<8x96xf32> to vector<8x32xf32>
    %411 = vector.extract_strided_slice %401 {offsets = [0, 96], sizes = [8, 32], strides = [1, 1]} : vector<8x128xf32> to vector<8x32xf32>
    %412 = math.tanh %411 : vector<8x32xf32>
    %413 = arith.mulf %409, %389 : vector<8x32xf32>
    %414 = arith.mulf %408, %412 : vector<8x32xf32>
    %415 = arith.addf %413, %414 : vector<8x32xf32>
    %416 = math.tanh %415 : vector<8x32xf32>
    %417 = arith.mulf %410, %416 : vector<8x32xf32>
    %418 = arith.index_cast %c6_i32_123 : i32 to index
    %c0_128 = arith.constant 0 : index
    %c0_129 = arith.constant 0 : index
    %419 = vector.load %arg8[%418, %c0_128, %c0_129] : memref<8x8x32xf32, #tpu.memory_space<vmem>>, vector<1x8x32xf32>
    %420 = vector.shape_cast %419 : vector<1x8x32xf32> to vector<8x32xf32>
    %421 = vector.shape_cast %417 : vector<8x32xf32> to vector<1x8x32xf32>
    tpu.vector_store %arg8[%418, %c0_128, %c0_129], %421 {strides = array<i32>} : memref<8x8x32xf32, #tpu.memory_space<vmem>>, vector<1x8x32xf32>,
    %c7_i32_130 = arith.constant 7 : i32
    %422 = arith.index_cast %c7_i32_130 : i32 to index
    %c0_131 = arith.constant 0 : index
    %c0_132 = arith.constant 0 : index
    %423 = vector.load %arg9[%422, %c0_131, %c0_132] : memref<8x8x128xf32, #tpu.memory_space<vmem>>, vector<1x8x128xf32>
    %424 = vector.shape_cast %423 : vector<1x8x128xf32> to vector<8x128xf32>
    %425 = arith.truncf %417 : vector<8x32xf32> to vector<8x32xbf16>
    %cst_133 = arith.constant dense<0.000000e+00> : vector<8x128xf32>
    %426 = tpu.matmul %425, %227, %cst_133 {dimension_numbers = #tpu.dot_dimension_numbers<[1], [0], [0], [1], [0, 0, 1, 1], [], []>} : vector<8x32xbf16>, vector<32x128xbf16>, vector<8x128xf32> -> vector<8x128xf32>
    %427 = arith.addf %424, %426 : vector<8x128xf32>
    %428 = vector.extract_strided_slice %427 {offsets = [0, 0], sizes = [8, 96], strides = [1, 1]} : vector<8x128xf32> to vector<8x96xf32>
    %429 = arith.negf %428 : vector<8x96xf32>
    %430 = math.exp %429 : vector<8x96xf32>
    %cst_134 = arith.constant 1.000000e+00 : f32
    %431 = vector.broadcast %cst_134 : f32 to vector<8x96xf32>
    %432 = arith.addf %431, %430 : vector<8x96xf32>
    %433 = arith.divf %431, %432 : vector<8x96xf32>
    %434 = vector.extract_strided_slice %433 {offsets = [0, 0], sizes = [8, 32], strides = [1, 1]} : vector<8x96xf32> to vector<8x32xf32>
    %435 = vector.extract_strided_slice %433 {offsets = [0, 32], sizes = [8, 32], strides = [1, 1]} : vector<8x96xf32> to vector<8x32xf32>
    %436 = vector.extract_strided_slice %433 {offsets = [0, 64], sizes = [8, 32], strides = [1, 1]} : vector<8x96xf32> to vector<8x32xf32>
    %437 = vector.extract_strided_slice %427 {offsets = [0, 96], sizes = [8, 32], strides = [1, 1]} : vector<8x128xf32> to vector<8x32xf32>
    %438 = math.tanh %437 : vector<8x32xf32>
    %439 = arith.mulf %435, %415 : vector<8x32xf32>
    %440 = arith.mulf %434, %438 : vector<8x32xf32>
    %441 = arith.addf %439, %440 : vector<8x32xf32>
    %442 = math.tanh %441 : vector<8x32xf32>
    %443 = arith.mulf %436, %442 : vector<8x32xf32>
    %444 = arith.index_cast %c7_i32_130 : i32 to index
    %c0_135 = arith.constant 0 : index
    %c0_136 = arith.constant 0 : index
    %445 = vector.load %arg8[%444, %c0_135, %c0_136] : memref<8x8x32xf32, #tpu.memory_space<vmem>>, vector<1x8x32xf32>
    %446 = vector.shape_cast %445 : vector<1x8x32xf32> to vector<8x32xf32>
    %447 = vector.shape_cast %443 : vector<8x32xf32> to vector<1x8x32xf32>
    tpu.vector_store %arg8[%444, %c0_135, %c0_136], %447 {strides = array<i32>} : memref<8x8x32xf32, #tpu.memory_space<vmem>>, vector<1x8x32xf32>,
    %c8_i32_137 = arith.constant 8 : i32
    %c0_138 = arith.constant 0 : index
    %c0_139 = arith.constant 0 : index
    %c0_140 = arith.constant 0 : index
    %448 = vector.load %arg8[%c0_138, %c0_139, %c0_140] : memref<8x8x32xf32, #tpu.memory_space<vmem>>, vector<1x8x32xf32>
    %449 = vector.shape_cast %448 : vector<1x8x32xf32> to vector<8x32xf32>
    %c0_141 = arith.constant 0 : index
    %c0_142 = arith.constant 0 : index
    %c0_143 = arith.constant 0 : index
    %450 = vector.load %arg5[%c0_141, %c0_142, %c0_143] : memref<8x1x32xf32, #tpu.memory_space<vmem>>, vector<1x1x32xf32>
    %451 = vector.shape_cast %450 : vector<1x1x32xf32> to vector<1x32xf32>
    %452 = vector.broadcast %451 : vector<1x32xf32> to vector<8x32xf32>
    %453 = arith.mulf %449, %452 : vector<8x32xf32>
    %c1_144 = arith.constant 1 : index
    %c0_145 = arith.constant 0 : index
    %c0_146 = arith.constant 0 : index
    %454 = vector.load %arg8[%c1_144, %c0_145, %c0_146] : memref<8x8x32xf32, #tpu.memory_space<vmem>>, vector<1x8x32xf32>
    %455 = vector.shape_cast %454 : vector<1x8x32xf32> to vector<8x32xf32>
    %c1_147 = arith.constant 1 : index
    %c0_148 = arith.constant 0 : index
    %c0_149 = arith.constant 0 : index
    %456 = vector.load %arg5[%c1_147, %c0_148, %c0_149] : memref<8x1x32xf32, #tpu.memory_space<vmem>>, vector<1x1x32xf32>
    %457 = vector.shape_cast %456 : vector<1x1x32xf32> to vector<1x32xf32>
    %458 = vector.broadcast %457 : vector<1x32xf32> to vector<8x32xf32>
    %459 = arith.mulf %455, %458 : vector<8x32xf32>
    %460 = arith.addf %453, %459 : vector<8x32xf32>
    %c2 = arith.constant 2 : index
    %c0_150 = arith.constant 0 : index
    %c0_151 = arith.constant 0 : index
    %461 = vector.load %arg8[%c2, %c0_150, %c0_151] : memref<8x8x32xf32, #tpu.memory_space<vmem>>, vector<1x8x32xf32>
    %462 = vector.shape_cast %461 : vector<1x8x32xf32> to vector<8x32xf32>
    %c2_152 = arith.constant 2 : index
    %c0_153 = arith.constant 0 : index
    %c0_154 = arith.constant 0 : index
    %463 = vector.load %arg5[%c2_152, %c0_153, %c0_154] : memref<8x1x32xf32, #tpu.memory_space<vmem>>, vector<1x1x32xf32>
    %464 = vector.shape_cast %463 : vector<1x1x32xf32> to vector<1x32xf32>
    %465 = vector.broadcast %464 : vector<1x32xf32> to vector<8x32xf32>
    %466 = arith.mulf %462, %465 : vector<8x32xf32>
    %467 = arith.addf %460, %466 : vector<8x32xf32>
    %c3 = arith.constant 3 : index
    %c0_155 = arith.constant 0 : index
    %c0_156 = arith.constant 0 : index
    %468 = vector.load %arg8[%c3, %c0_155, %c0_156] : memref<8x8x32xf32, #tpu.memory_space<vmem>>, vector<1x8x32xf32>
    %469 = vector.shape_cast %468 : vector<1x8x32xf32> to vector<8x32xf32>
    %c3_157 = arith.constant 3 : index
    %c0_158 = arith.constant 0 : index
    %c0_159 = arith.constant 0 : index
    %470 = vector.load %arg5[%c3_157, %c0_158, %c0_159] : memref<8x1x32xf32, #tpu.memory_space<vmem>>, vector<1x1x32xf32>
    %471 = vector.shape_cast %470 : vector<1x1x32xf32> to vector<1x32xf32>
    %472 = vector.broadcast %471 : vector<1x32xf32> to vector<8x32xf32>
    %473 = arith.mulf %469, %472 : vector<8x32xf32>
    %474 = arith.addf %467, %473 : vector<8x32xf32>
    %c4 = arith.constant 4 : index
    %c0_160 = arith.constant 0 : index
    %c0_161 = arith.constant 0 : index
    %475 = vector.load %arg8[%c4, %c0_160, %c0_161] : memref<8x8x32xf32, #tpu.memory_space<vmem>>, vector<1x8x32xf32>
    %476 = vector.shape_cast %475 : vector<1x8x32xf32> to vector<8x32xf32>
    %c4_162 = arith.constant 4 : index
    %c0_163 = arith.constant 0 : index
    %c0_164 = arith.constant 0 : index
    %477 = vector.load %arg5[%c4_162, %c0_163, %c0_164] : memref<8x1x32xf32, #tpu.memory_space<vmem>>, vector<1x1x32xf32>
    %478 = vector.shape_cast %477 : vector<1x1x32xf32> to vector<1x32xf32>
    %479 = vector.broadcast %478 : vector<1x32xf32> to vector<8x32xf32>
    %480 = arith.mulf %476, %479 : vector<8x32xf32>
    %481 = arith.addf %474, %480 : vector<8x32xf32>
    %c5 = arith.constant 5 : index
    %c0_165 = arith.constant 0 : index
    %c0_166 = arith.constant 0 : index
    %482 = vector.load %arg8[%c5, %c0_165, %c0_166] : memref<8x8x32xf32, #tpu.memory_space<vmem>>, vector<1x8x32xf32>
    %483 = vector.shape_cast %482 : vector<1x8x32xf32> to vector<8x32xf32>
    %c5_167 = arith.constant 5 : index
    %c0_168 = arith.constant 0 : index
    %c0_169 = arith.constant 0 : index
    %484 = vector.load %arg5[%c5_167, %c0_168, %c0_169] : memref<8x1x32xf32, #tpu.memory_space<vmem>>, vector<1x1x32xf32>
    %485 = vector.shape_cast %484 : vector<1x1x32xf32> to vector<1x32xf32>
    %486 = vector.broadcast %485 : vector<1x32xf32> to vector<8x32xf32>
    %487 = arith.mulf %483, %486 : vector<8x32xf32>
    %488 = arith.addf %481, %487 : vector<8x32xf32>
    %c6 = arith.constant 6 : index
    %c0_170 = arith.constant 0 : index
    %c0_171 = arith.constant 0 : index
    %489 = vector.load %arg8[%c6, %c0_170, %c0_171] : memref<8x8x32xf32, #tpu.memory_space<vmem>>, vector<1x8x32xf32>
    %490 = vector.shape_cast %489 : vector<1x8x32xf32> to vector<8x32xf32>
    %c6_172 = arith.constant 6 : index
    %c0_173 = arith.constant 0 : index
    %c0_174 = arith.constant 0 : index
    %491 = vector.load %arg5[%c6_172, %c0_173, %c0_174] : memref<8x1x32xf32, #tpu.memory_space<vmem>>, vector<1x1x32xf32>
    %492 = vector.shape_cast %491 : vector<1x1x32xf32> to vector<1x32xf32>
    %493 = vector.broadcast %492 : vector<1x32xf32> to vector<8x32xf32>
    %494 = arith.mulf %490, %493 : vector<8x32xf32>
    %495 = arith.addf %488, %494 : vector<8x32xf32>
    %c7 = arith.constant 7 : index
    %c0_175 = arith.constant 0 : index
    %c0_176 = arith.constant 0 : index
    %496 = vector.load %arg8[%c7, %c0_175, %c0_176] : memref<8x8x32xf32, #tpu.memory_space<vmem>>, vector<1x8x32xf32>
    %497 = vector.shape_cast %496 : vector<1x8x32xf32> to vector<8x32xf32>
    %c7_177 = arith.constant 7 : index
    %c0_178 = arith.constant 0 : index
    %c0_179 = arith.constant 0 : index
    %498 = vector.load %arg5[%c7_177, %c0_178, %c0_179] : memref<8x1x32xf32, #tpu.memory_space<vmem>>, vector<1x1x32xf32>
    %499 = vector.shape_cast %498 : vector<1x1x32xf32> to vector<1x32xf32>
    %500 = vector.broadcast %499 : vector<1x32xf32> to vector<8x32xf32>
    %501 = arith.mulf %497, %500 : vector<8x32xf32>
    %502 = arith.addf %495, %501 : vector<8x32xf32>
    %cst_180 = arith.constant dense<0.000000e+00> : vector<8xf32>
    %503 = vector.multi_reduction <add>, %502, %cst_180 [1] : vector<8x32xf32> to vector<8xf32>
    %504 = vector.shape_cast %503 : vector<8xf32> to vector<8x1xf32>
    %c0_181 = arith.constant 0 : index
    %c0_182 = arith.constant 0 : index
    %505 = memref.load %arg6[%c0_181, %c0_182] : memref<1x1xf32, #tpu.memory_space<smem>>
    %506 = vector.broadcast %505 : f32 to vector<8x1xf32>
    %507 = arith.addf %504, %506 : vector<8x1xf32>
    %c0_183 = arith.constant 0 : index
    %c0_184 = arith.constant 0 : index
    %508 = vector.load %arg7[%c0_183, %c0_184] : memref<8x1xf32, #tpu.memory_space<vmem>>, vector<8x1xf32>
    tpu.vector_store %arg7[%c0_183, %c0_184], %507 {strides = array<i32>} : memref<8x1xf32, #tpu.memory_space<vmem>>, vector<8x1xf32>,
    return
  }
  func.func @transform_0(%arg0: i32) -> (i32, i32, i32) {
    %c0_i32 = arith.constant 0 : i32
    %c0_i32_0 = arith.constant 0 : i32
    %c0_i32_1 = arith.constant 0 : i32
    return %c0_i32, %arg0, %c0_i32_0 : i32, i32, i32
  }
  func.func @transform_1(%arg0: i32) -> (i32, i32, i32) {
    %c0_i32 = arith.constant 0 : i32
    %c0_i32_0 = arith.constant 0 : i32
    %c0_i32_1 = arith.constant 0 : i32
    %c0_i32_2 = arith.constant 0 : i32
    return %c0_i32, %c0_i32_0, %c0_i32_1 : i32, i32, i32
  }
  func.func @transform_2(%arg0: i32) -> (i32, i32, i32) {
    %c0_i32 = arith.constant 0 : i32
    %c0_i32_0 = arith.constant 0 : i32
    %c0_i32_1 = arith.constant 0 : i32
    %c0_i32_2 = arith.constant 0 : i32
    return %c0_i32, %c0_i32_0, %c0_i32_1 : i32, i32, i32
  }
  func.func @transform_3(%arg0: i32) -> (i32, i32, i32) {
    %c0_i32 = arith.constant 0 : i32
    %c0_i32_0 = arith.constant 0 : i32
    %c0_i32_1 = arith.constant 0 : i32
    %c0_i32_2 = arith.constant 0 : i32
    return %c0_i32, %c0_i32_0, %c0_i32_1 : i32, i32, i32
  }
  func.func @transform_4(%arg0: i32) -> (i32, i32, i32) {
    %c0_i32 = arith.constant 0 : i32
    %c0_i32_0 = arith.constant 0 : i32
    %c0_i32_1 = arith.constant 0 : i32
    %c0_i32_2 = arith.constant 0 : i32
    return %c0_i32, %c0_i32_0, %c0_i32_1 : i32, i32, i32
  }
  func.func @transform_5(%arg0: i32) -> (i32, i32) {
    %c0_i32 = arith.constant 0 : i32
    %c0_i32_0 = arith.constant 0 : i32
    %c0_i32_1 = arith.constant 0 : i32
    return %c0_i32, %c0_i32_0 : i32, i32
  }
  func.func @transform_6(%arg0: i32) -> (i32, i32) {
    %c0_i32 = arith.constant 0 : i32
    %c0_i32_0 = arith.constant 0 : i32
    return %arg0, %c0_i32 : i32, i32
  }
}

</mosaic_0001>

<bundles_post_ra>
// kernel: tpu_custom_call.1
= control target key start
LH: loop header
LB: loop body
LE: loop exit
PB: predicated region body
PF: predicated region fallthrough
CT: control target
= control target key end

     0   :  { %12 = vsyncpa [#allocation6], 0  ;;  %s2061_s0 = inlined_call_operand.hbm [shape: f32[8,8,32], index: 0, kind: input, shape index: {}]   ;;  %s2062_s1 = inlined_call_operand.hbm [shape: bf16[2,32,128], index: 1, kind: input, shape index: {}]   ;;  %s2063_s2 = inlined_call_operand.hbm [shape: bf16[2,32,128], index: 2, kind: input, shape index: {}]   ;;  %s2064_s3 = inlined_call_operand.vmem [shape: f32[2,1,128], index: 3, kind: input, shape index: {}]   ;;  %s2065_s4 = inlined_call_operand.hbm [shape: f32[8,1,32], index: 4, kind: input, shape index: {}]   ;;  %s2066_s5 = inlined_call_operand.<no memory space> [shape: f32[1,1], index: 5, kind: input, shape index: {}]   ;;  %s2067_s6 = inlined_call_operand.vmem [shape: f32[8,1], index: 6, kind: output, shape index: {}]  }
   0x1   :  { %13 = vsyncpa [#allocation8], 0  ;;  %s32_s23 = sshll.u32 %s2062_s1, 4  ;;  %s33_s23 = int_to_ptr.hbm [resolvable:$true] %s32_s23 }
   0x2   :  { %14 = vsyncpa [#allocation11], 0  ;;  %s1722_s24 = smov [#allocation7]   ;;  %s19_s28 = sshll.u32 %s2061_s0, 4  ;;  %s20_s28 = int_to_ptr.hbm [resolvable:$true] %s19_s28 }
   0x3   :  { %s34_s25 = sshll.u32 %s1722_s24, 4  ;;  %s1723_s29 = smov 64   ;;  %s35_s25 = int_to_ptr.vmem [resolvable:$true] %s34_s25 }
   0x4   :  { %s1724_s30 = smov 4   ;;  %s1725_s7 = smov [#allocation5]  }
   0x5   :  { %40 = dma.hbm_to_vmem [thread:$0]  %s33_s23, 512, %s35_s25, [#allocation8], %s1723_s29, %s1723_s29, %s1724_s30  }
   0x6   :  { %s21_s8 = sshll.u32 %s1725_s7, 4  ;;  %s1726_s9 = smov 128   ;;  %s22_s8 = int_to_ptr.vmem [resolvable:$true] %s21_s8 }
   0x7   :  { %s1727_s1 = smov 8   ;;  %s45_s12 = sshll.u32 %s2063_s2, 4  ;;  %s46_s12 = int_to_ptr.hbm [resolvable:$true] %s45_s12 }
   0x8   :  { %27 = dma.hbm_to_vmem [thread:$0]  %s20_s28, 1024, %s22_s8, [#allocation6], %s1726_s9, %s1726_s9, %s1727_s1  }
   0x9   :  { %s1728_s13 = smov [#allocation9]   ;;  %s60_s16 = sshll.u32 %s2065_s4, 4  ;;  %s61_s16 = int_to_ptr.hbm [resolvable:$true] %s60_s16 }
   0xa   :  { %s47_s14 = sshll.u32 %s1728_s13, 4  ;;  %s1729_s17 = smov [#allocation10]   ;;  %s48_s14 = int_to_ptr.vmem [resolvable:$true] %s47_s14 }
   0xb   :  { %53 = dma.hbm_to_vmem [thread:$0]  %s46_s12, 512, %s48_s14, [#allocation8], %s1723_s29, %s1723_s29, %s1724_s30  }
   0xc   :  { %s62_s18 = sshll.u32 %s1729_s17, 4  ;;  %s1730_s19 = smov 16   ;;  %s63_s18 = int_to_ptr.vmem [resolvable:$true] %s62_s18 }
   0xd   :  { %s1731_s20 = smov 1  }
   0xe   :  { %68 = dma.hbm_to_vmem [thread:$0]  %s61_s16, 128, %s63_s18, [#allocation11], %s1730_s19, %s1730_s19, %s1731_s20  }
   0xf   :  { %1716 = dma.done.wait [#allocation6], 1024  }
  0x10   :  { %1717 = vsyncadd [#allocation6], 4294966272 }
  0x11   :  { %1718 = dma.done.wait [#allocation8], 1024  }
  0x12   :  { %1719 = vsyncadd [#allocation8], 4294966272 }
  0x13   :  { %1720 = dma.done.wait [#allocation11], 128  }
  0x14   :  { %1721 = vsyncadd [#allocation11], 4294967168  ;;  %v1462_v0 = vld [vmem:[#allocation7 + $0x8] sm:$0xff]  ;;  %v1461_v2 = vld [vmem:[#allocation7] sm:$0xff]  ;;  %vm124_vm0 = vcmask 261120   ;;  %v1732_v7 = vmov 0  }
  0x15   :  { %v1785_v1 = vld [vmem:[#allocation9 + $0x8] sm:$0xff]  ;;  %v1787_v3 = vld [vmem:[#allocation9] sm:$0xff]  ;;  %143 = vmatpush.bf16.msra.mxu0 %v1462_v0  ;;  %s1733_s21 = smov 32   ;;  %v99_v63 = vld [vmem:[#allocation5 + $0x10] sm:$0xff] }
  0x16   :  { %v97_v4 = vld [vmem:[#allocation5] sm:$0xff]  ;;  %196 = vmatpush.bf16.msra.mxu1 %v1785_v1  ;;  %v98_v5 = vld [vmem:[#allocation5 + $0x8] sm:$0xff]  ;;  %261 = vmatpush.bf16.msra.mxu2 %v1785_v1  ;;  %v100_v0 = vld [vmem:[#allocation5 + $0x18] sm:$0xff] }
  0x17   :  { %327 = vmatpush.bf16.msra.mxu3 %v1785_v1  ;;  %v105_v6 = vpack.c.bf16 %v98_v5, %v97_v4  ;;  %v1808_v8 = vld [vmem:[%s2064_s3] ss:$0 sm:$0xff] }
  0x19   :  { %144 = vmatpush.bf16.msra.mxu0 %v1461_v2 }
  0x1a   :  { %197 = vmatpush.bf16.msra.mxu1 %v1787_v3  ;;  %262 = vmatpush.bf16.msra.mxu2 %v1787_v3 }
  0x1b   :  { %328 = vmatpush.bf16.msra.mxu3 %v1787_v3 }
  0x1c   :  { %1398 = vmatmul.msk.bf16.vlgmr.msra.gmra.mxu0 %vm124_vm0, %v105_v6 }
  0x1d   :  { %198 = vmatmul.bf16.vlgmr.msra.gmra.mxu1 %v1732_v7 }
  0x1e   :  { %393 = vmatpush.bf16.msrb.mxu1 %v1785_v1  ;;  %459 = vmatpush.bf16.msrb.mxu2 %v1785_v1 }
  0x1f   :  { %525 = vmatpush.bf16.msrb.mxu3 %v1785_v1 }
  0x22   :  { %394 = vmatpush.bf16.msrb.mxu1 %v1787_v3  ;;  %460 = vmatpush.bf16.msrb.mxu2 %v1787_v3 }
  0x23   :  { %526 = vmatpush.bf16.msrb.mxu3 %v1787_v3 }
  0x26   :  { %591 = vmatpush.bf16.msra.mxu1 %v1785_v1 }
  0x2a   :  { %592 = vmatpush.bf16.msra.mxu1 %v1787_v3 }
  0x99   :  { %v146_v9 = vpop.f32.mrf.mxu0 }
  0x9a   :  { %v199_v10 = vpop.f32.mrf.mxu1  ;;  %v147_v11 = vadd.f32 %v1808_v8, %v146_v9 }
  0x9c   :  { %v203_v12 = vadd.f32 %v199_v10, %v147_v11 }
  0x9e   :  { %1491 = vtanh.f32 %v203_v12  ;;  %v1410_v15 = vmul.f32 -1.442695, %v203_v12 }
  0xa0   :  { %1493 = vpow2.f32 %v1410_v15 }
  0xa1   :  { %v148_v38 = vpop.f32.mrf.mxu0 }
  0xa2   :  { %v201_v13 = vpop.f32.mrf.mxu1  ;;  %v149_v39 = vadd.f32 %v1808_v8, %v148_v38 }
  0xa4   :  { %v1492_v14 = vpop.eup %1491 }
  0xa5   :  { %226 = vrot.lane.b32.xlu0 %v1492_v14, %s1733_s21 }
  0xa6   :  { %v1494_v16 = vpop.eup %1493 }
  0xa7   :  { %v207_v17 = vadd.f32 1.0, %v1494_v16 }
  0xa9   :  { %1495 = vrcp.f32 %v207_v17  ;;  %v219_v23 = vand.u32 2147483648, %v207_v17  ;;  %vm213_vm2 = vweird.f32 %v207_v17  ;;  %v217_v24 = vand.u32 2147483647, %v207_v17 }
  0xab   :  { %v220_v26 = vor.u32 1.1754944e-38, %v219_v23  ;;  %vm218_vm4 = vcmp.eq.f32.partialorder %v217_v24, 8.507059e+37 }
  0xaf   :  { %v1496_v18 = vpop.eup %1495 }
  0xb0   :  { %v209_v19 = vmul.f32 %v1496_v18, %v207_v17  ;;  %vm214_vm1 = vweird.f32 %v1496_v18 }
  0xb1   :  { %vm215_vm3 = vmor %vm213_vm2, %vm214_vm1 }
  0xb2   :  { %v210_v20 = vsub.f32 1.0, %v209_v19 }
  0xb4   :  { %v211_v21 = vmul.f32 %v1496_v18, %v210_v20 }
  0xb6   :  { %v212_v22 = vadd.f32 %v1496_v18, %v211_v21 }
  0xb8   :  { %v216_v25 = vsel %vm215_vm3, %v1496_v18, %v212_v22 }
  0xb9   :  { %v221_v28 = vsel %vm218_vm4, %v220_v26, %v216_v25 }
  0xba   :  { %v224_v30 = vmul.f32 0.0, %v221_v28 }
 0x117   :  { %v227_v27 = vpop.permute.xlu0 %226 }
 0x118   :  { %v229_v29 = vmul.f32 %v227_v27, %v221_v28 }
 0x11a   :  { %231 = vrot.lane.b32.xlu0 %v229_v29, %s1733_s21 }
 0x18c   :  { %v232_v31 = vpop.permute.xlu0 %231 }
 0x18d   :  { %v234_v32 = vadd.f32 %v232_v31, %v224_v30 }
 0x18f   :  { %1497 = vtanh.f32 %v234_v32 }
 0x195   :  { %v1498_v33 = vpop.eup %1497 }
 0x196   :  { %237 = vrot.lane.b32.xlu1 %v1498_v33, %s1733_s21 }
 0x208   :  { %v238_v34 = vpop.permute.xlu1 %237 }
 0x209   :  { %v1814_v35 = vmul.f32 %v238_v34, %v221_v28 }
 0x20b   :  { %v248_v36 = vpack.c.bf16 %v1814_v35, %v1814_v35 }
 0x20d   :  { %250 = vrot.lane.b32.xlu1 %v248_v36, %s1723_s29 }
 0x27f   :  { %v251_v37 = vpop.permute.xlu1 %250 }
 0x280   :  { %1411 = vmatmul.msk.bf16.vlgmr.msra.gmra.mxu2 %vm124_vm0, %v251_v37 }
 0x281   :  { %657 = vmatpush.bf16.msra.mxu2 %v1785_v1  ;;  %v106_v1 = vpack.c.bf16 %v100_v0, %v99_v63  ;;  %v101_v63 = vld [vmem:[#allocation5 + $0x20] sm:$0xff]  ;;  %v102_v0 = vld [vmem:[#allocation5 + $0x28] sm:$0xff] }
 0x283   :  { %1399 = vmatmul.msk.bf16.gmra.mxu0 %vm124_vm0, %v106_v1  ;;  %v107_v1 = vpack.c.bf16 %v102_v0, %v101_v63 }
 0x285   :  { %658 = vmatpush.bf16.msra.mxu2 %v1787_v3 }
 0x293   :  { %1400 = vmatmul.msk.bf16.gmra.mxu0 %vm124_vm0, %v107_v1 }
 0x300   :  { %v151_v6 = vpop.f32.mrf.mxu0 }
 0x301   :  { %v152_v9 = vadd.f32 %v1808_v8, %v151_v6 }
 0x303   :  { %v264_v40 = vpop.f32.mrf.mxu2 }
 0x304   :  { %v268_v41 = vadd.f32 %v264_v40, %v149_v39 }
 0x306   :  { %1499 = vtanh.f32 %v268_v41  ;;  %v1412_v44 = vmul.f32 -1.442695, %v268_v41 }
 0x308   :  { %1501 = vpow2.f32 %v1412_v44  ;;  %v153_v38 = vpop.f32.mrf.mxu0 }
 0x309   :  { %v154_v39 = vadd.f32 %v1808_v8, %v153_v38 }
 0x30b   :  { %v266_v42 = vpop.f32.mrf.mxu2 }
 0x30c   :  { %v1500_v43 = vpop.eup %1499 }
 0x30d   :  { %291 = vrot.lane.b32.xlu2 %v1500_v43, %s1733_s21 }
 0x30e   :  { %v1502_v45 = vpop.eup %1501 }
 0x30f   :  { %v272_v46 = vadd.f32 1.0, %v1502_v45 }
 0x311   :  { %1503 = vrcp.f32 %v272_v46  ;;  %v284_v52 = vand.u32 2147483648, %v272_v46  ;;  %vm278_vm6 = vweird.f32 %v272_v46  ;;  %v282_v53 = vand.u32 2147483647, %v272_v46 }
 0x313   :  { %v285_v55 = vor.u32 1.1754944e-38, %v284_v52  ;;  %vm283_vm8 = vcmp.eq.f32.partialorder %v282_v53, 8.507059e+37 }
 0x317   :  { %v1504_v47 = vpop.eup %1503 }
 0x318   :  { %v274_v48 = vmul.f32 %v1504_v47, %v272_v46  ;;  %vm279_vm5 = vweird.f32 %v1504_v47 }
 0x319   :  { %vm280_vm7 = vmor %vm278_vm6, %vm279_vm5 }
 0x31a   :  { %v275_v49 = vsub.f32 1.0, %v274_v48 }
 0x31c   :  { %v276_v50 = vmul.f32 %v1504_v47, %v275_v49 }
 0x31e   :  { %v277_v51 = vadd.f32 %v1504_v47, %v276_v50 }
 0x320   :  { %v281_v54 = vsel %vm280_vm7, %v1504_v47, %v277_v51 }
 0x321   :  { %v286_v57 = vsel %vm283_vm8, %v285_v55, %v281_v54 }
 0x322   :  { %v289_v59 = vmul.f32 %v286_v57, %v234_v32 }
 0x367   :  { %v292_v56 = vpop.permute.xlu2 %291 }
 0x368   :  { %v294_v58 = vmul.f32 %v292_v56, %v286_v57 }
 0x36a   :  { %296 = vrot.lane.b32.xlu2 %v294_v58, %s1733_s21 }
 0x3c4   :  { %v297_v60 = vpop.permute.xlu2 %296 }
 0x3c5   :  { %v299_v61 = vadd.f32 %v297_v60, %v289_v59 }
 0x3c7   :  { %1505 = vtanh.f32 %v299_v61 }
 0x3cd   :  { %v1506_v62 = vpop.eup %1505 }
 0x3ce   :  { %302 = vrot.lane.b32.xlu0 %v1506_v62, %s1733_s21 }
 0x440   :  { %v303_v2 = vpop.permute.xlu0 %302 }
 0x441   :  { %v1827_v3 = vmul.f32 %v303_v2, %v286_v57 }
 0x443   :  { %v314_v4 = vpack.c.bf16 %v1827_v3, %v1827_v3 }
 0x445   :  { %316 = vrot.lane.b32.xlu1 %v314_v4, %s1723_s29 }
 0x4b7   :  { %v317_v5 = vpop.permute.xlu1 %316 }
 0x4b8   :  { %1413 = vmatmul.msk.bf16.vlgmr.msra.gmra.mxu3 %vm124_vm0, %v317_v5 }
 0x53b   :  { %v330_v10 = vpop.f32.mrf.mxu3 }
 0x53c   :  { %v334_v11 = vadd.f32 %v330_v10, %v152_v9  ;;  %v156_v9 = vpop.f32.mrf.mxu0 }
 0x53d   :  { %v157_v10 = vadd.f32 %v1808_v8, %v156_v9 }
 0x53e   :  { %1507 = vtanh.f32 %v334_v11  ;;  %v1414_v14 = vmul.f32 -1.442695, %v334_v11 }
 0x540   :  { %1509 = vpow2.f32 %v1414_v14 }
 0x543   :  { %v332_v12 = vpop.f32.mrf.mxu3 }
 0x544   :  { %v1508_v13 = vpop.eup %1507 }
 0x545   :  { %357 = vrot.lane.b32.xlu2 %v1508_v13, %s1733_s21 }
 0x546   :  { %v1510_v15 = vpop.eup %1509 }
 0x547   :  { %v338_v16 = vadd.f32 1.0, %v1510_v15 }
 0x549   :  { %1511 = vrcp.f32 %v338_v16  ;;  %v350_v22 = vand.u32 2147483648, %v338_v16  ;;  %vm344_vm10 = vweird.f32 %v338_v16  ;;  %v348_v23 = vand.u32 2147483647, %v338_v16 }
 0x54b   :  { %v351_v25 = vor.u32 1.1754944e-38, %v350_v22  ;;  %vm349_vm12 = vcmp.eq.f32.partialorder %v348_v23, 8.507059e+37 }
 0x54f   :  { %v1512_v17 = vpop.eup %1511 }
 0x550   :  { %v340_v18 = vmul.f32 %v1512_v17, %v338_v16  ;;  %vm345_vm9 = vweird.f32 %v1512_v17 }
 0x551   :  { %vm346_vm11 = vmor %vm344_vm10, %vm345_vm9 }
 0x552   :  { %v341_v19 = vsub.f32 1.0, %v340_v18 }
 0x554   :  { %v342_v20 = vmul.f32 %v1512_v17, %v341_v19 }
 0x556   :  { %v343_v21 = vadd.f32 %v1512_v17, %v342_v20 }
 0x558   :  { %v347_v24 = vsel %vm346_vm11, %v1512_v17, %v343_v21 }
 0x559   :  { %v352_v27 = vsel %vm349_vm12, %v351_v25, %v347_v24 }
 0x55a   :  { %v355_v29 = vmul.f32 %v352_v27, %v299_v61 }
 0x59f   :  { %v358_v26 = vpop.permute.xlu2 %357 }
 0x5a0   :  { %v360_v28 = vmul.f32 %v358_v26, %v352_v27 }
 0x5a2   :  { %362 = vrot.lane.b32.xlu0 %v360_v28, %s1733_s21 }
 0x614   :  { %v363_v30 = vpop.permute.xlu0 %362 }
 0x615   :  { %v365_v31 = vadd.f32 %v363_v30, %v355_v29 }
 0x617   :  { %1513 = vtanh.f32 %v365_v31 }
 0x61d   :  { %v1514_v32 = vpop.eup %1513 }
 0x61e   :  { %368 = vrot.lane.b32.xlu1 %v1514_v32, %s1733_s21 }
 0x690   :  { %v369_v33 = vpop.permute.xlu1 %368 }
 0x691   :  { %v1837_v34 = vmul.f32 %v369_v33, %v352_v27 }
 0x693   :  { %v380_v36 = vpack.c.bf16 %v1837_v34, %v1837_v34 }
 0x695   :  { %382 = vrot.lane.b32.xlu2 %v380_v36, %s1723_s29 }
 0x6ef   :  { %v383_v37 = vpop.permute.xlu2 %382 }
 0x6f0   :  { %1415 = vmatmul.msk.bf16.vlgmr.msrb.gmra.mxu1 %vm124_vm0, %v383_v37 }
 0x76d   :  { %v396_v40 = vpop.f32.mrf.mxu1 }
 0x76e   :  { %v400_v41 = vadd.f32 %v396_v40, %v154_v39  ;;  %v158_v40 = vpop.f32.mrf.mxu0 }
 0x770   :  { %1515 = vtanh.f32 %v400_v41  ;;  %v1416_v44 = vmul.f32 -1.442695, %v400_v41  ;;  %v159_v41 = vadd.f32 %v1808_v8, %v158_v40 }
 0x772   :  { %1517 = vpow2.f32 %v1416_v44 }
 0x775   :  { %v398_v42 = vpop.f32.mrf.mxu1 }
 0x776   :  { %v1516_v43 = vpop.eup %1515 }
 0x777   :  { %423 = vrot.lane.b32.xlu0 %v1516_v43, %s1733_s21 }
 0x778   :  { %v1518_v45 = vpop.eup %1517 }
 0x779   :  { %v404_v46 = vadd.f32 1.0, %v1518_v45 }
 0x77b   :  { %1519 = vrcp.f32 %v404_v46  ;;  %v416_v52 = vand.u32 2147483648, %v404_v46  ;;  %vm410_vm14 = vweird.f32 %v404_v46  ;;  %v414_v53 = vand.u32 2147483647, %v404_v46 }
 0x77d   :  { %v417_v55 = vor.u32 1.1754944e-38, %v416_v52  ;;  %vm415_vm1 = vcmp.eq.f32.partialorder %v414_v53, 8.507059e+37 }
 0x781   :  { %v1520_v47 = vpop.eup %1519 }
 0x782   :  { %v406_v48 = vmul.f32 %v1520_v47, %v404_v46  ;;  %vm411_vm13 = vweird.f32 %v1520_v47 }
 0x783   :  { %vm412_vm15 = vmor %vm410_vm14, %vm411_vm13 }
 0x784   :  { %v407_v49 = vsub.f32 1.0, %v406_v48 }
 0x786   :  { %v408_v50 = vmul.f32 %v1520_v47, %v407_v49 }
 0x788   :  { %v409_v51 = vadd.f32 %v1520_v47, %v408_v50 }
 0x78a   :  { %v413_v54 = vsel %vm412_vm15, %v1520_v47, %v409_v51 }
 0x78b   :  { %v418_v57 = vsel %vm415_vm1, %v417_v55, %v413_v54 }
 0x78c   :  { %v421_v59 = vmul.f32 %v418_v57, %v365_v31 }
 0x7e9   :  { %v424_v56 = vpop.permute.xlu0 %423 }
 0x7ea   :  { %v426_v58 = vmul.f32 %v424_v56, %v418_v57 }
 0x7ec   :  { %428 = vrot.lane.b32.xlu1 %v426_v58, %s1733_s21 }
 0x85e   :  { %v429_v60 = vpop.permute.xlu1 %428 }
 0x85f   :  { %v431_v61 = vadd.f32 %v429_v60, %v421_v59 }
 0x861   :  { %1521 = vtanh.f32 %v431_v61 }
 0x867   :  { %v1522_v62 = vpop.eup %1521 }
 0x868   :  { %434 = vrot.lane.b32.xlu2 %v1522_v62, %s1733_s21  ;;  %v1465_v62 = vld [vmem:[#allocation7 + $0x10] sm:$0xff] }
 0x8c2   :  { %v435_v2 = vpop.permute.xlu2 %434 }
 0x8c3   :  { %v1848_v4 = vmul.f32 %v435_v2, %v418_v57 }
 0x8c5   :  { %v446_v5 = vpack.c.bf16 %v1848_v4, %v1848_v4 }
 0x8c7   :  { %448 = vrot.lane.b32.xlu0 %v446_v5, %s1723_s29 }
 0x939   :  { %v449_v6 = vpop.permute.xlu0 %448 }
 0x93a   :  { %1417 = vmatmul.msk.bf16.vlgmr.msrb.gmra.mxu2 %vm124_vm0, %v449_v6 }
 0x9bd   :  { %v462_v11 = vpop.f32.mrf.mxu2 }
 0x9be   :  { %v466_v12 = vadd.f32 %v462_v11, %v157_v10 }
 0x9c0   :  { %1523 = vtanh.f32 %v466_v12  ;;  %v1418_v15 = vmul.f32 -1.442695, %v466_v12 }
 0x9c2   :  { %1525 = vpow2.f32 %v1418_v15 }
 0x9c5   :  { %v464_v13 = vpop.f32.mrf.mxu2 }
 0x9c6   :  { %v1524_v14 = vpop.eup %1523  ;;  %v103_v13 = vld [vmem:[#allocation5 + $0x30] sm:$0xff] }
 0x9c7   :  { %489 = vrot.lane.b32.xlu1 %v1524_v14, %s1733_s21  ;;  %v104_v14 = vld [vmem:[#allocation5 + $0x38] sm:$0xff] }
 0x9c8   :  { %v1526_v16 = vpop.eup %1525  ;;  %v108_v15 = vpack.c.bf16 %v104_v14, %v103_v13 }
 0x9c9   :  { %v470_v17 = vadd.f32 1.0, %v1526_v16  ;;  %v1884_v16 = vld [vmem:[#allocation9 + $0x18] sm:$0xff] }
 0x9ca   :  { %1401 = vmatmul.msk.bf16.gmra.mxu0 %vm124_vm0, %v108_v15  ;;  %815 = vmatpush.bf16.msrb.mxu1 %v1884_v16 }
 0x9cb   :  { %1527 = vrcp.f32 %v470_v17  ;;  %v482_v23 = vand.u32 2147483648, %v470_v17  ;;  %vm476_vm3 = vweird.f32 %v470_v17  ;;  %v480_v24 = vand.u32 2147483647, %v470_v17  ;;  %879 = vmatpush.bf16.msrb.mxu2 %v1884_v16  ;;  %943 = vmatpush.bf16.msrb.mxu0 %v1884_v16 }
 0x9cd   :  { %v483_v26 = vor.u32 1.1754944e-38, %v482_v23  ;;  %vm481_vm5 = vcmp.eq.f32.partialorder %v480_v24, 8.507059e+37 }
 0x9d1   :  { %v1528_v18 = vpop.eup %1527 }
 0x9d2   :  { %v472_v19 = vmul.f32 %v1528_v18, %v470_v17  ;;  %vm477_vm2 = vweird.f32 %v1528_v18  ;;  %v1887_v17 = vld [vmem:[#allocation9 + $0x10] sm:$0xff] }
 0x9d3   :  { %vm478_vm4 = vmor %vm476_vm3, %vm477_vm2  ;;  %816 = vmatpush.bf16.msrb.mxu1 %v1887_v17  ;;  %880 = vmatpush.bf16.msrb.mxu2 %v1887_v17 }
 0x9d4   :  { %v473_v20 = vsub.f32 1.0, %v472_v19  ;;  %944 = vmatpush.bf16.msrb.mxu0 %v1887_v17 }
 0x9d6   :  { %v474_v21 = vmul.f32 %v1528_v18, %v473_v20 }
 0x9d8   :  { %v475_v22 = vadd.f32 %v1528_v18, %v474_v21  ;;  %1135 = vmatpush.bf16.msra.mxu0 %v1884_v16 }
 0x9da   :  { %v479_v25 = vsel %vm478_vm4, %v1528_v18, %v475_v22 }
 0x9db   :  { %v484_v28 = vsel %vm481_vm5, %v483_v26, %v479_v25  ;;  %v1907_v25 = vld [vmem:[%s2064_s3 + $0x1] ss:$0 sm:$0xff] }
 0x9dc   :  { %v487_v30 = vmul.f32 %v484_v28, %v431_v61  ;;  %v1466_v61 = vld [vmem:[#allocation7 + $0x18] sm:$0xff]  ;;  %1136 = vmatpush.bf16.msra.mxu0 %v1887_v17 }
 0x9dd   :  { %765 = vmatpush.bf16.msra.mxu3 %v1466_v61 }
 0x9e1   :  { %766 = vmatpush.bf16.msra.mxu3 %v1465_v62 }
 0xa39   :  { %v490_v27 = vpop.permute.xlu1 %489 }
 0xa3a   :  { %v492_v29 = vmul.f32 %v490_v27, %v484_v28 }
 0xa3c   :  { %494 = vrot.lane.b32.xlu2 %v492_v29, %s1733_s21 }
 0xa47   :  { %v161_v19 = vpop.f32.mrf.mxu0 }
 0xa48   :  { %v162_v20 = vadd.f32 %v1808_v8, %v161_v19 }
 0xa96   :  { %v495_v31 = vpop.permute.xlu2 %494 }
 0xa97   :  { %v497_v32 = vadd.f32 %v495_v31, %v487_v30 }
 0xa99   :  { %1529 = vtanh.f32 %v497_v32 }
 0xa9f   :  { %v1530_v33 = vpop.eup %1529 }
 0xaa0   :  { %500 = vrot.lane.b32.xlu0 %v1530_v33, %s1733_s21 }
 0xb12   :  { %v501_v36 = vpop.permute.xlu0 %500 }
 0xb13   :  { %v1858_v37 = vmul.f32 %v501_v36, %v484_v28 }
 0xb15   :  { %v512_v38 = vpack.c.bf16 %v1858_v37, %v1858_v37 }
 0xb17   :  { %514 = vrot.lane.b32.xlu1 %v512_v38, %s1723_s29 }
 0xb89   :  { %v515_v39 = vpop.permute.xlu1 %514 }
 0xb8a   :  { %1419 = vmatmul.msk.bf16.vlgmr.msrb.gmra.mxu3 %vm124_vm0, %v515_v39 }
 0xc0d   :  { %v528_v42 = vpop.f32.mrf.mxu3 }
 0xc0e   :  { %v532_v43 = vadd.f32 %v528_v42, %v159_v41 }
 0xc10   :  { %1531 = vtanh.f32 %v532_v43  ;;  %v1420_v46 = vmul.f32 -1.442695, %v532_v43 }
 0xc12   :  { %1533 = vpow2.f32 %v1420_v46 }
 0xc15   :  { %v530_v44 = vpop.f32.mrf.mxu3 }
 0xc16   :  { %v1532_v45 = vpop.eup %1531 }
 0xc17   :  { %555 = vrot.lane.b32.xlu2 %v1532_v45, %s1733_s21 }
 0xc18   :  { %v1534_v47 = vpop.eup %1533 }
 0xc19   :  { %v536_v48 = vadd.f32 1.0, %v1534_v47 }
 0xc1b   :  { %1535 = vrcp.f32 %v536_v48  ;;  %v548_v54 = vand.u32 2147483648, %v536_v48  ;;  %vm542_vm7 = vweird.f32 %v536_v48  ;;  %v546_v55 = vand.u32 2147483647, %v536_v48 }
 0xc1d   :  { %v549_v57 = vor.u32 1.1754944e-38, %v548_v54  ;;  %vm547_vm9 = vcmp.eq.f32.partialorder %v546_v55, 8.507059e+37 }
 0xc1f   :  { %242 = vrot.lane.b32.xlu2 %v1814_v35, %s1723_s29 }
 0xc21   :  { %v1536_v49 = vpop.eup %1535 }
 0xc22   :  { %v538_v50 = vmul.f32 %v1536_v49, %v536_v48  ;;  %vm543_vm6 = vweird.f32 %v1536_v49 }
 0xc23   :  { %vm544_vm8 = vmor %vm542_vm7, %vm543_vm6 }
 0xc24   :  { %v539_v51 = vsub.f32 1.0, %v538_v50 }
 0xc26   :  { %v540_v52 = vmul.f32 %v1536_v49, %v539_v51 }
 0xc28   :  { %v541_v53 = vadd.f32 %v1536_v49, %v540_v52 }
 0xc2a   :  { %v545_v56 = vsel %vm544_vm8, %v1536_v49, %v541_v53 }
 0xc2b   :  { %v550_v35 = vsel %vm547_vm9, %v549_v57, %v545_v56 }
 0xc2c   :  { %v553_v63 = vmul.f32 %v550_v35, %v497_v32 }
 0xc71   :  { %v556_v58 = vpop.permute.xlu2 %555 }
 0xc72   :  { %v558_v59 = vmul.f32 %v556_v58, %v550_v35 }
 0xc74   :  { %560 = vrot.lane.b32.xlu0 %v558_v59, %s1733_s21 }
 0xc79   :  { %v243_v60 = vpop.permute.xlu2 %242 }
 0xc7a   :  { %245 = vst.msk [vmem:[#allocation2] sm:$0xff] %vm124_vm0, %v243_v60 }
 0xc7c   :  { %307 = vrot.lane.b32.xlu0 %v1827_v3, %s1723_s29 }
 0xc81   :  { %v720_v6 = vld [vmem:[#allocation2] sm:$0xff] }
 0xce6   :  { %v561_v0 = vpop.permute.xlu0 %560 }
 0xce7   :  { %v1872_v1 = vadd.f32 %v561_v0, %v553_v63 }
 0xce9   :  { %1537 = vtanh.f32 %v1872_v1 }
 0xcee   :  { %v308_v2 = vpop.permute.xlu0 %307 }
 0xcef   :  { %v1538_v5 = vpop.eup %1537  ;;  %311 = vst.msk [vmem:[#allocation2 + $0x8] sm:$0xff] %vm124_vm0, %v308_v2 }
 0xcf0   :  { %566 = vrot.lane.b32.xlu1 %v1538_v5, %s1733_s21 }
 0xcf6   :  { %v721_v9 = vld [vmem:[#allocation2 + $0x8] sm:$0xff] }
 0xcf7   :  { %v728_v10 = vpack.c.bf16 %v721_v9, %v720_v6 }
 0xcf9   :  { %1434 = vmatmul.msk.bf16.vlgmr.msra.gmra.mxu3 %vm124_vm0, %v728_v10 }
 0xd62   :  { %v567_v3 = vpop.permute.xlu1 %566 }
 0xd63   :  { %v1878_v11 = vmul.f32 %v567_v3, %v550_v35 }
 0xd65   :  { %v578_v12 = vpack.c.bf16 %v1878_v11, %v1878_v11 }
 0xd67   :  { %580 = vrot.lane.b32.xlu1 %v578_v12, %s1723_s29 }
 0xdd9   :  { %v581_v18 = vpop.permute.xlu1 %580 }
 0xdda   :  { %1421 = vmatmul.msk.bf16.vlgmr.msra.gmra.mxu1 %vm124_vm0, %v581_v18 }
 0xddb   :  { %1007 = vmatpush.bf16.msra.mxu1 %v1884_v16 }
 0xddf   :  { %1008 = vmatpush.bf16.msra.mxu1 %v1887_v17 }
 0xdea   :  { %817 = vmatmul.bf16.vlgmr.msrb.gmra.mxu1 %v1732_v7  ;;  %v768_v7 = vpop.f32.mrf.mxu3 }
 0xdeb   :  { %1199 = vmatpush.bf16.msrb.mxu1 %v1884_v16  ;;  %v769_v26 = vadd.f32 %v1907_v25, %v768_v7 }
 0xdef   :  { %1200 = vmatpush.bf16.msrb.mxu1 %v1887_v17 }
 0xe57   :  { %v594_v21 = vpop.f32.mrf.mxu1 }
 0xe58   :  { %v598_v22 = vadd.f32 %v594_v21, %v162_v20 }
 0xe5a   :  { %1539 = vtanh.f32 %v598_v22  ;;  %v1422_v30 = vmul.f32 -1.442695, %v598_v22  ;;  %v770_v22 = vpop.f32.mrf.mxu3 }
 0xe5f   :  { %v596_v23 = vpop.f32.mrf.mxu1 }
 0xe60   :  { %v1540_v24 = vpop.eup %1539  ;;  %v771_v23 = vadd.f32 %v1907_v25, %v770_v22 }
 0xe61   :  { %621 = vrot.lane.b32.xlu2 %v1540_v24, %s1733_s21 }
 0xe67   :  { %v818_v27 = vpop.f32.mrf.mxu1 }
 0xe68   :  { %v822_v28 = vadd.f32 %v818_v27, %v769_v26 }
 0xe6a   :  { %1541 = vtanh.f32 %v822_v28  ;;  %v1446_v42 = vmul.f32 -1.442695, %v822_v28 }
 0xe6b   :  { %1543 = vpow2.f32 %v1422_v30 }
 0xe6f   :  { %v820_v29 = vpop.f32.mrf.mxu1 }
 0xe70   :  { %v1542_v8 = vpop.eup %1541 }
 0xe71   :  { %845 = vrot.lane.b32.xlu0 %v1542_v8, %s1733_s21  ;;  %v1544_v31 = vpop.eup %1543 }
 0xe72   :  { %v602_v32 = vadd.f32 1.0, %v1544_v31 }
 0xe74   :  { %1545 = vrcp.f32 %v602_v32  ;;  %v614_v41 = vand.u32 2147483648, %v602_v32  ;;  %vm608_vm11 = vweird.f32 %v602_v32  ;;  %v612_v43 = vand.u32 2147483647, %v602_v32 }
 0xe75   :  { %1547 = vpow2.f32 %v1446_v42 }
 0xe76   :  { %v615_v45 = vor.u32 1.1754944e-38, %v614_v41  ;;  %vm613_vm13 = vcmp.eq.f32.partialorder %v612_v43, 8.507059e+37 }
 0xe7a   :  { %v1546_v33 = vpop.eup %1545 }
 0xe7b   :  { %v604_v36 = vmul.f32 %v1546_v33, %v602_v32  ;;  %vm609_vm10 = vweird.f32 %v1546_v33  ;;  %v1548_v49 = vpop.eup %1547 }
 0xe7c   :  { %vm610_vm12 = vmor %vm608_vm11, %vm609_vm10  ;;  %v826_v50 = vadd.f32 1.0, %v1548_v49 }
 0xe7d   :  { %v605_v38 = vsub.f32 1.0, %v604_v36 }
 0xe7e   :  { %1549 = vrcp.f32 %v826_v50  ;;  %v838_v56 = vand.u32 2147483648, %v826_v50  ;;  %vm832_vm15 = vweird.f32 %v826_v50  ;;  %v836_v57 = vand.u32 2147483647, %v826_v50 }
 0xe7f   :  { %v606_v39 = vmul.f32 %v1546_v33, %v605_v38 }
 0xe80   :  { %v839_v35 = vor.u32 1.1754944e-38, %v838_v56  ;;  %vm837_vm2 = vcmp.eq.f32.partialorder %v836_v57, 8.507059e+37 }
 0xe81   :  { %v607_v40 = vadd.f32 %v1546_v33, %v606_v39 }
 0xe83   :  { %v611_v44 = vsel %vm610_vm12, %v1546_v33, %v607_v40 }
 0xe84   :  { %v616_v47 = vsel %vm613_vm13, %v615_v45, %v611_v44  ;;  %v1550_v51 = vpop.eup %1549 }
 0xe85   :  { %v828_v52 = vmul.f32 %v1550_v51, %v826_v50  ;;  %vm833_vm14 = vweird.f32 %v1550_v51  ;;  %v619_v62 = vmul.f32 %v616_v47, %v1872_v1 }
 0xe86   :  { %vm834_vm1 = vmor %vm832_vm15, %vm833_vm14 }
 0xe87   :  { %v829_v53 = vsub.f32 1.0, %v828_v52 }
 0xe89   :  { %v830_v54 = vmul.f32 %v1550_v51, %v829_v53 }
 0xe8b   :  { %v831_v55 = vadd.f32 %v1550_v51, %v830_v54  ;;  %v1954_v54 = vpop.f32.mrf.mxu0 }
 0xe8d   :  { %v835_v58 = vsel %vm834_vm1, %v1550_v51, %v831_v55 }
 0xe8e   :  { %v840_v60 = vsel %vm837_vm2, %v839_v35, %v835_v58 }
 0xe8f   :  { %v843_v5 = vmul.f32 0.0, %v840_v60 }
 0xebb   :  { %v622_v46 = vpop.permute.xlu2 %621 }
 0xebc   :  { %v624_v48 = vmul.f32 %v622_v46, %v616_v47 }
 0xebe   :  { %626 = vrot.lane.b32.xlu1 %v624_v48, %s1733_s21 }
 0xee3   :  { %v846_v59 = vpop.permute.xlu0 %845 }
 0xee4   :  { %v848_v61 = vmul.f32 %v846_v59, %v840_v60 }
 0xee6   :  { %850 = vrot.lane.b32.xlu2 %v848_v61, %s1733_s21 }
 0xf30   :  { %v627_v63 = vpop.permute.xlu1 %626 }
 0xf31   :  { %v1914_v0 = vadd.f32 %v627_v63, %v619_v62 }
 0xf33   :  { %1551 = vtanh.f32 %v1914_v0 }
 0xf39   :  { %v1552_v2 = vpop.eup %1551 }
 0xf3a   :  { %632 = vrot.lane.b32.xlu0 %v1552_v2, %s1733_s21 }
 0xf40   :  { %v851_v6 = vpop.permute.xlu2 %850 }
 0xf41   :  { %v853_v9 = vadd.f32 %v851_v6, %v843_v5 }
 0xf43   :  { %1553 = vtanh.f32 %v853_v9 }
 0xf49   :  { %v1554_v10 = vpop.eup %1553 }
 0xf4a   :  { %856 = vrot.lane.b32.xlu1 %v1554_v10, %s1733_s21 }
 0xfac   :  { %v633_v3 = vpop.permute.xlu0 %632 }
 0xfad   :  { %v1919_v12 = vmul.f32 %v633_v3, %v616_v47 }
 0xfaf   :  { %v644_v1 = vpack.c.bf16 %v1919_v12, %v1919_v12 }
 0xfb1   :  { %646 = vrot.lane.b32.xlu2 %v644_v1, %s1723_s29 }
 0xfbc   :  { %v857_v13 = vpop.permute.xlu1 %856 }
 0xfbd   :  { %v1924_v14 = vmul.f32 %v857_v13, %v840_v60 }
 0xfbf   :  { %v866_v15 = vpack.c.bf16 %v1924_v14, %v1924_v14 }
 0xfc1   :  { %868 = vrot.lane.b32.xlu0 %v866_v15, %s1723_s29 }
0x100b   :  { %v647_v18 = vpop.permute.xlu2 %646 }
0x100c   :  { %1423 = vmatmul.msk.bf16.vlgmr.msra.gmra.mxu2 %vm124_vm0, %v647_v18 }
0x100d   :  { %1071 = vmatpush.bf16.msra.mxu2 %v1884_v16 }
0x1011   :  { %1072 = vmatpush.bf16.msra.mxu2 %v1887_v17 }
0x1033   :  { %v869_v19 = vpop.permute.xlu0 %868 }
0x1034   :  { %1447 = vmatmul.msk.bf16.vlgmr.msrb.gmra.mxu2 %vm124_vm0, %v869_v19 }
0x1035   :  { %1263 = vmatpush.bf16.msrb.mxu2 %v1884_v16 }
0x1039   :  { %1264 = vmatpush.bf16.msrb.mxu2 %v1887_v17 }
0x108f   :  { %v1935_v20 = vpop.f32.mrf.mxu2 }
0x1097   :  { %v662_v21 = vpop.f32.mrf.mxu2 }
0x10b7   :  { %v882_v24 = vpop.f32.mrf.mxu2 }
0x10b8   :  { %v886_v7 = vadd.f32 %v882_v24, %v771_v23 }
0x10ba   :  { %1555 = vtanh.f32 %v886_v7  ;;  %v1448_v28 = vmul.f32 -1.442695, %v886_v7 }
0x10bc   :  { %1557 = vpow2.f32 %v1448_v28 }
0x10bf   :  { %v884_v26 = vpop.f32.mrf.mxu2 }
0x10c0   :  { %v1556_v27 = vpop.eup %1555 }
0x10c1   :  { %909 = vrot.lane.b32.xlu1 %v1556_v27, %s1733_s21 }
0x10c2   :  { %v1558_v16 = vpop.eup %1557 }
0x10c3   :  { %v890_v17 = vadd.f32 1.0, %v1558_v16 }
0x10c5   :  { %1559 = vrcp.f32 %v890_v17  ;;  %v902_v33 = vand.u32 2147483648, %v890_v17  ;;  %vm896_vm4 = vweird.f32 %v890_v17  ;;  %v900_v36 = vand.u32 2147483647, %v890_v17 }
0x10c7   :  { %v903_v39 = vor.u32 1.1754944e-38, %v902_v33  ;;  %vm901_vm6 = vcmp.eq.f32.partialorder %v900_v36, 8.507059e+37 }
0x10c9   :  { %373 = vrot.lane.b32.xlu1 %v1837_v34, %s1723_s29 }
0x10cb   :  { %v1560_v29 = vpop.eup %1559 }
0x10cc   :  { %v892_v8 = vmul.f32 %v1560_v29, %v890_v17  ;;  %vm897_vm3 = vweird.f32 %v1560_v29 }
0x10cd   :  { %vm898_vm5 = vmor %vm896_vm4, %vm897_vm3 }
0x10ce   :  { %v893_v30 = vsub.f32 1.0, %v892_v8 }
0x10d0   :  { %v894_v31 = vmul.f32 %v1560_v29, %v893_v30 }
0x10d2   :  { %v895_v32 = vadd.f32 %v1560_v29, %v894_v31 }
0x10d4   :  { %v899_v38 = vsel %vm898_vm5, %v1560_v29, %v895_v32 }
0x10d5   :  { %v904_v34 = vsel %vm901_vm6, %v903_v39, %v899_v38 }
0x10d6   :  { %v907_v43 = vmul.f32 %v904_v34, %v853_v9 }
0x1133   :  { %v910_v40 = vpop.permute.xlu1 %909 }
0x1134   :  { %v912_v41 = vmul.f32 %v910_v40, %v904_v34 }
0x1136   :  { %914 = vrot.lane.b32.xlu2 %v912_v41, %s1733_s21 }
0x113b   :  { %v374_v42 = vpop.permute.xlu1 %373 }
0x113c   :  { %377 = vst.msk [vmem:[#allocation2 + $0x10] sm:$0xff] %vm124_vm0, %v374_v42 }
0x113e   :  { %439 = vrot.lane.b32.xlu2 %v1848_v4, %s1723_s29 }
0x1143   :  { %v722_v48 = vld [vmem:[#allocation2 + $0x10] sm:$0xff] }
0x1190   :  { %v915_v44 = vpop.permute.xlu2 %914 }
0x1191   :  { %v917_v45 = vadd.f32 %v915_v44, %v907_v43 }
0x1193   :  { %1561 = vtanh.f32 %v917_v45 }
0x1198   :  { %v440_v46 = vpop.permute.xlu2 %439 }
0x1199   :  { %v1562_v47 = vpop.eup %1561  ;;  %443 = vst.msk [vmem:[#allocation2 + $0x18] sm:$0xff] %vm124_vm0, %v440_v46 }
0x119a   :  { %920 = vrot.lane.b32.xlu0 %v1562_v47, %s1733_s21 }
0x11a0   :  { %v723_v49 = vld [vmem:[#allocation2 + $0x18] sm:$0xff] }
0x11a1   :  { %v729_v50 = vpack.c.bf16 %v723_v49, %v722_v48 }
0x11a3   :  { %1435 = vmatmul.msk.bf16.gmra.mxu3 %vm124_vm0, %v729_v50 }
0x120c   :  { %v921_v51 = vpop.permute.xlu0 %920 }
0x120d   :  { %v1948_v52 = vmul.f32 %v921_v51, %v904_v34 }
0x120f   :  { %v930_v4 = vpack.c.bf16 %v1948_v52, %v1948_v52 }
0x1211   :  { %932 = vrot.lane.b32.xlu0 %v930_v4, %s1723_s29 }
0x1226   :  { %v773_v55 = vpop.f32.mrf.mxu3 }
0x1227   :  { %v774_v56 = vadd.f32 %v1907_v25, %v773_v55 }
0x122e   :  { %v775_v16 = vpop.f32.mrf.mxu3 }
0x122f   :  { %v776_v17 = vadd.f32 %v1907_v25, %v775_v16 }
0x1283   :  { %v933_v53 = vpop.permute.xlu0 %932 }
0x1284   :  { %1449 = vmatmul.msk.bf16.vlgmr.msrb.gmra.mxu0 %vm124_vm0, %v933_v53 }
0x1301   :  { %v946_v57 = vpop.f32.mrf.mxu0 }
0x1302   :  { %v950_v58 = vadd.f32 %v946_v57, %v774_v56 }
0x1304   :  { %1563 = vtanh.f32 %v950_v58  ;;  %v1450_v60 = vmul.f32 -1.442695, %v950_v58 }
0x1306   :  { %1565 = vpow2.f32 %v1450_v60 }
0x1309   :  { %v948_v35 = vpop.f32.mrf.mxu0 }
0x130a   :  { %v1564_v59 = vpop.eup %1563 }
0x130b   :  { %973 = vrot.lane.b32.xlu1 %v1564_v59, %s1733_s21 }
0x130c   :  { %v1566_v61 = vpop.eup %1565 }
0x130d   :  { %v954_v62 = vadd.f32 1.0, %v1566_v61 }
0x130f   :  { %1567 = vrcp.f32 %v954_v62  ;;  %v966_v10 = vand.u32 2147483648, %v954_v62  ;;  %vm960_vm8 = vweird.f32 %v954_v62  ;;  %v964_v3 = vand.u32 2147483647, %v954_v62 }
0x1311   :  { %v967_v13 = vor.u32 1.1754944e-38, %v966_v10  ;;  %vm965_vm10 = vcmp.eq.f32.partialorder %v964_v3, 8.507059e+37 }
0x1315   :  { %v1568_v63 = vpop.eup %1567 }
0x1316   :  { %v956_v2 = vmul.f32 %v1568_v63, %v954_v62  ;;  %vm961_vm7 = vweird.f32 %v1568_v63 }
0x1317   :  { %vm962_vm9 = vmor %vm960_vm8, %vm961_vm7 }
0x1318   :  { %v957_v5 = vsub.f32 1.0, %v956_v2 }
0x131a   :  { %v958_v6 = vmul.f32 %v1568_v63, %v957_v5 }
0x131c   :  { %v959_v9 = vadd.f32 %v1568_v63, %v958_v6 }
0x131e   :  { %v963_v1 = vsel %vm962_vm9, %v1568_v63, %v959_v9 }
0x131f   :  { %v968_v18 = vsel %vm965_vm10, %v967_v13, %v963_v1 }
0x1320   :  { %v971_v21 = vmul.f32 %v968_v18, %v917_v45 }
0x137d   :  { %v974_v15 = vpop.permute.xlu1 %973 }
0x137e   :  { %v976_v19 = vmul.f32 %v974_v15, %v968_v18 }
0x1380   :  { %978 = vrot.lane.b32.xlu2 %v976_v19, %s1733_s21 }
0x13da   :  { %v979_v22 = vpop.permute.xlu2 %978 }
0x13db   :  { %v981_v23 = vadd.f32 %v979_v22, %v971_v21 }
0x13dd   :  { %1569 = vtanh.f32 %v981_v23 }
0x13e3   :  { %v1570_v24 = vpop.eup %1569 }
0x13e4   :  { %984 = vrot.lane.b32.xlu0 %v1570_v24, %s1733_s21 }
0x1456   :  { %v985_v7 = vpop.permute.xlu0 %984 }
0x1457   :  { %v1960_v26 = vmul.f32 %v985_v7, %v968_v18 }
0x1459   :  { %v994_v27 = vpack.c.bf16 %v1960_v26, %v1960_v26 }
0x145b   :  { %996 = vrot.lane.b32.xlu1 %v994_v27, %s1723_s29 }
0x14cd   :  { %v997_v28 = vpop.permute.xlu1 %996 }
0x14ce   :  { %1451 = vmatmul.msk.bf16.vlgmr.msra.gmra.mxu1 %vm124_vm0, %v997_v28 }
0x154b   :  { %v1010_v29 = vpop.f32.mrf.mxu1 }
0x154c   :  { %v1014_v8 = vadd.f32 %v1010_v29, %v776_v17 }
0x154e   :  { %1571 = vtanh.f32 %v1014_v8  ;;  %v1452_v32 = vmul.f32 -1.442695, %v1014_v8 }
0x1550   :  { %1573 = vpow2.f32 %v1452_v32 }
0x1553   :  { %v1012_v30 = vpop.f32.mrf.mxu1 }
0x1554   :  { %v1572_v31 = vpop.eup %1571 }
0x1555   :  { %1037 = vrot.lane.b32.xlu2 %v1572_v31, %s1733_s21 }
0x1556   :  { %v1574_v33 = vpop.eup %1573 }
0x1557   :  { %v1018_v36 = vadd.f32 1.0, %v1574_v33 }
0x1559   :  { %1575 = vrcp.f32 %v1018_v36  ;;  %v1030_v42 = vand.u32 2147483648, %v1018_v36  ;;  %vm1024_vm12 = vweird.f32 %v1018_v36  ;;  %v1028_v43 = vand.u32 2147483647, %v1018_v36 }
0x155b   :  { %v1031_v45 = vor.u32 1.1754944e-38, %v1030_v42  ;;  %vm1029_vm14 = vcmp.eq.f32.partialorder %v1028_v43, 8.507059e+37 }
0x155d   :  { %505 = vrot.lane.b32.xlu2 %v1858_v37, %s1723_s29 }
0x155f   :  { %v1576_v38 = vpop.eup %1575 }
0x1560   :  { %v1020_v39 = vmul.f32 %v1576_v38, %v1018_v36  ;;  %vm1025_vm11 = vweird.f32 %v1576_v38 }
0x1561   :  { %vm1026_vm13 = vmor %vm1024_vm12, %vm1025_vm11 }
0x1562   :  { %v1021_v40 = vsub.f32 1.0, %v1020_v39 }
0x1564   :  { %v1022_v34 = vmul.f32 %v1576_v38, %v1021_v40 }
0x1566   :  { %v1023_v41 = vadd.f32 %v1576_v38, %v1022_v34 }
0x1568   :  { %v1027_v44 = vsel %vm1026_vm13, %v1576_v38, %v1023_v41 }
0x1569   :  { %v1032_v37 = vsel %vm1029_vm14, %v1031_v45, %v1027_v44 }
0x156a   :  { %v1035_v49 = vmul.f32 %v1032_v37, %v981_v23  ;;  %v1619_v23 = vld [vmem:[%s2064_s3] ss:$0 sm:$0xff] }
0x156b   :  { %v164_v24 = vadd.f32 %v1619_v23, %v1954_v54 }
0x156d   :  { %v664_v27 = vadd.f32 %v1935_v20, %v164_v24 }
0x156f   :  { %v1424_v32 = vmul.f32 -1.442695, %v664_v27 }
0x15af   :  { %v1038_v46 = vpop.permute.xlu2 %1037 }
0x15b0   :  { %v1040_v47 = vmul.f32 %v1038_v46, %v1032_v37 }
0x15b2   :  { %1042 = vrot.lane.b32.xlu0 %v1040_v47, %s1733_s21 }
0x15b7   :  { %v506_v48 = vpop.permute.xlu2 %505 }
0x15b8   :  { %509 = vst.msk [vmem:[#allocation2 + $0x20] sm:$0xff] %vm124_vm0, %v506_v48 }
0x15ba   :  { %571 = vrot.lane.b32.xlu0 %v1878_v11, %s1723_s29 }
0x15bf   :  { %v724_v55 = vld [vmem:[#allocation2 + $0x20] sm:$0xff] }
0x1624   :  { %v1043_v50 = vpop.permute.xlu0 %1042 }
0x1625   :  { %v1045_v51 = vadd.f32 %v1043_v50, %v1035_v49 }
0x1627   :  { %1577 = vtanh.f32 %v1045_v51 }
0x162c   :  { %v572_v4 = vpop.permute.xlu0 %571 }
0x162d   :  { %v1578_v53 = vpop.eup %1577  ;;  %575 = vst.msk [vmem:[#allocation2 + $0x28] sm:$0xff] %vm124_vm0, %v572_v4 }
0x162e   :  { %1048 = vrot.lane.b32.xlu1 %v1578_v53, %s1733_s21 }
0x1634   :  { %v725_v56 = vld [vmem:[#allocation2 + $0x28] sm:$0xff] }
0x1635   :  { %v730_v57 = vpack.c.bf16 %v725_v56, %v724_v55 }
0x1637   :  { %1436 = vmatmul.msk.bf16.gmra.mxu3 %vm124_vm0, %v730_v57 }
0x16a0   :  { %v1049_v58 = vpop.permute.xlu1 %1048 }
0x16a1   :  { %v1977_v35 = vmul.f32 %v1049_v58, %v1032_v37 }
0x16a3   :  { %v1058_v11 = vpack.c.bf16 %v1977_v35, %v1977_v35 }
0x16a5   :  { %1060 = vrot.lane.b32.xlu1 %v1058_v11, %s1723_s29 }
0x16ba   :  { %v778_v60 = vpop.f32.mrf.mxu3 }
0x16bb   :  { %v779_v61 = vadd.f32 %v1907_v25, %v778_v60 }
0x1717   :  { %v1061_v59 = vpop.permute.xlu1 %1060 }
0x1718   :  { %1453 = vmatmul.msk.bf16.vlgmr.msra.gmra.mxu2 %vm124_vm0, %v1061_v59 }
0x179b   :  { %v1074_v62 = vpop.f32.mrf.mxu2 }
0x179c   :  { %v1078_v63 = vadd.f32 %v1074_v62, %v779_v61 }
0x179e   :  { %1579 = vtanh.f32 %v1078_v63  ;;  %v1454_v6 = vmul.f32 -1.442695, %v1078_v63 }
0x17a0   :  { %1581 = vpow2.f32 %v1454_v6 }
0x17a3   :  { %v1076_v2 = vpop.f32.mrf.mxu2 }
0x17a4   :  { %v1580_v5 = vpop.eup %1579 }
0x17a5   :  { %1101 = vrot.lane.b32.xlu2 %v1580_v5, %s1733_s21 }
0x17a6   :  { %v1582_v9 = vpop.eup %1581 }
0x17a7   :  { %v1082_v10 = vadd.f32 1.0, %v1582_v9 }
0x17a9   :  { %1583 = vrcp.f32 %v1082_v10  ;;  %v1094_v19 = vand.u32 2147483648, %v1082_v10  ;;  %vm1088_vm1 = vweird.f32 %v1082_v10  ;;  %v1092_v21 = vand.u32 2147483647, %v1082_v10 }
0x17aa   :  { %1585 = vtanh.f32 %v664_v27 }
0x17ab   :  { %v1095_v7 = vor.u32 1.1754944e-38, %v1094_v19  ;;  %vm1093_vm3 = vcmp.eq.f32.partialorder %v1092_v21, 8.507059e+37 }
0x17af   :  { %v1584_v3 = vpop.eup %1583 }
0x17b0   :  { %v1084_v1 = vmul.f32 %v1584_v3, %v1082_v10  ;;  %vm1089_vm15 = vweird.f32 %v1584_v3  ;;  %v1586_v29 = vpop.eup %1585 }
0x17b1   :  { %vm1090_vm2 = vmor %vm1088_vm1, %vm1089_vm15 }
0x17b2   :  { %v1085_v13 = vsub.f32 1.0, %v1084_v1 }
0x17b4   :  { %v1086_v15 = vmul.f32 %v1584_v3, %v1085_v13 }
0x17b6   :  { %v1087_v18 = vadd.f32 %v1584_v3, %v1086_v15 }
0x17b8   :  { %v1091_v22 = vsel %vm1090_vm2, %v1584_v3, %v1087_v18 }
0x17b9   :  { %v1096_v16 = vsel %vm1093_vm3, %v1095_v7, %v1091_v22 }
0x17ba   :  { %v1099_v8 = vmul.f32 %v1096_v16, %v1045_v51  ;;  %v780_v51 = vpop.f32.mrf.mxu3 }
0x17bb   :  { %v781_v4 = vadd.f32 %v1907_v25, %v780_v51 }
0x17ff   :  { %v1102_v28 = vpop.permute.xlu2 %1101 }
0x1800   :  { %v1104_v17 = vmul.f32 %v1102_v28, %v1096_v16 }
0x1802   :  { %1106 = vrot.lane.b32.xlu0 %v1104_v17, %s1733_s21 }
0x180a   :  { %687 = vrot.lane.b32.xlu0 %v1586_v29, %s1733_s21 }
0x1874   :  { %v1107_v30 = vpop.permute.xlu0 %1106 }
0x1875   :  { %v1992_v31 = vadd.f32 %v1107_v30, %v1099_v8 }
0x1877   :  { %1587 = vtanh.f32 %v1992_v31 }
0x1878   :  { %1589 = vpow2.f32 %v1424_v32 }
0x187c   :  { %v688_v47 = vpop.permute.xlu0 %687 }
0x187d   :  { %v1588_v54 = vpop.eup %1587 }
0x187e   :  { %1112 = vrot.lane.b32.xlu1 %v1588_v54, %s1733_s21  ;;  %v1590_v20 = vpop.eup %1589 }
0x187f   :  { %v668_v33 = vadd.f32 1.0, %v1590_v20 }
0x1881   :  { %1591 = vrcp.f32 %v668_v33  ;;  %v680_v44 = vand.u32 2147483648, %v668_v33  ;;  %vm674_vm5 = vweird.f32 %v668_v33  ;;  %v678_v45 = vand.u32 2147483647, %v668_v33 }
0x1883   :  { %v681_v37 = vor.u32 1.1754944e-38, %v680_v44  ;;  %vm679_vm7 = vcmp.eq.f32.partialorder %v678_v45, 8.507059e+37 }
0x1887   :  { %v1592_v36 = vpop.eup %1591 }
0x1888   :  { %v670_v38 = vmul.f32 %v1592_v36, %v668_v33  ;;  %vm675_vm4 = vweird.f32 %v1592_v36 }
0x1889   :  { %vm676_vm6 = vmor %vm674_vm5, %vm675_vm4  ;;  %vm1381_vm5 = vcmask 7168  }
0x188a   :  { %v671_v39 = vsub.f32 1.0, %v670_v38 }
0x188c   :  { %v672_v40 = vmul.f32 %v1592_v36, %v671_v39 }
0x188e   :  { %v673_v42 = vadd.f32 %v1592_v36, %v672_v40 }
0x1890   :  { %v677_v46 = vsel %vm676_vm6, %v1592_v36, %v673_v42 }
0x1891   :  { %v682_v48 = vsel %vm679_vm7, %v681_v37, %v677_v46 }
0x1892   :  { %v690_v49 = vmul.f32 %v688_v47, %v682_v48  ;;  %v685_v57 = vmul.f32 %v682_v48, %v1914_v0 }
0x18f0   :  { %v1113_v34 = vpop.permute.xlu1 %1112 }
0x18f1   :  { %v1996_v41 = vmul.f32 %v1113_v34, %v1096_v16 }
0x18f3   :  { %v1122_v43 = vpack.c.bf16 %v1996_v41, %v1996_v41 }
0x18f5   :  { %1124 = vrot.lane.b32.xlu2 %v1122_v43, %s1723_s29 }
0x18fd   :  { %692 = vrot.lane.b32.xlu2 %v690_v49, %s1733_s21 }
0x194f   :  { %v1125_v50 = vpop.permute.xlu2 %1124 }
0x1950   :  { %1455 = vmatmul.msk.bf16.vlgmr.msra.gmra.mxu0 %vm124_vm0, %v1125_v50 }
0x1957   :  { %v693_v56 = vpop.permute.xlu2 %692 }
0x1958   :  { %v695_v58 = vadd.f32 %v693_v56, %v685_v57 }
0x19cd   :  { %v1138_v53 = vpop.f32.mrf.mxu0 }
0x19ce   :  { %v1142_v55 = vadd.f32 %v1138_v53, %v781_v4 }
0x19d0   :  { %1593 = vtanh.f32 %v1142_v55  ;;  %v1456_v61 = vmul.f32 -1.442695, %v1142_v55 }
0x19d1   :  { %1595 = vtanh.f32 %v695_v58 }
0x19d2   :  { %1597 = vpow2.f32 %v1456_v61 }
0x19d5   :  { %v1140_v11 = vpop.f32.mrf.mxu0 }
0x19d6   :  { %v1594_v59 = vpop.eup %1593 }
0x19d7   :  { %1165 = vrot.lane.b32.xlu1 %v1594_v59, %s1733_s21  ;;  %v1596_v60 = vpop.eup %1595 }
0x19d8   :  { %v1598_v62 = vpop.eup %1597 }
0x19d9   :  { %v1146_v63 = vadd.f32 1.0, %v1598_v62 }
0x19db   :  { %1599 = vrcp.f32 %v1146_v63  ;;  %v1158_v0 = vand.u32 2147483648, %v1146_v63  ;;  %vm1152_vm9 = vweird.f32 %v1146_v63  ;;  %v1156_v3 = vand.u32 2147483647, %v1146_v63 }
0x19dd   :  { %v1159_v13 = vor.u32 1.1754944e-38, %v1158_v0  ;;  %vm1157_vm11 = vcmp.eq.f32.partialorder %v1156_v3, 8.507059e+37 }
0x19df   :  { %698 = vrot.lane.b32.xlu1 %v1596_v60, %s1733_s21 }
0x19e1   :  { %v1600_v2 = vpop.eup %1599 }
0x19e2   :  { %v1148_v5 = vmul.f32 %v1600_v2, %v1146_v63  ;;  %vm1153_vm8 = vweird.f32 %v1600_v2 }
0x19e3   :  { %vm1154_vm10 = vmor %vm1152_vm9, %vm1153_vm8 }
0x19e4   :  { %v1149_v6 = vsub.f32 1.0, %v1148_v5 }
0x19e6   :  { %v1150_v9 = vmul.f32 %v1600_v2, %v1149_v6 }
0x19e8   :  { %v1151_v10 = vadd.f32 %v1600_v2, %v1150_v9 }
0x19ea   :  { %v1155_v1 = vsel %vm1154_vm10, %v1600_v2, %v1151_v10 }
0x19eb   :  { %v1160_v18 = vsel %vm1157_vm11, %v1159_v13, %v1155_v1 }
0x19ec   :  { %v1163_v23 = vmul.f32 %v1160_v18, %v1992_v31 }
0x1a49   :  { %v1166_v15 = vpop.permute.xlu1 %1165 }
0x1a4a   :  { %v1168_v19 = vmul.f32 %v1166_v15, %v1160_v18 }
0x1a4c   :  { %1170 = vrot.lane.b32.xlu0 %v1168_v19, %s1733_s21 }
0x1a51   :  { %v699_v21 = vpop.permute.xlu1 %698 }
0x1a52   :  { %v701_v22 = vmul.f32 %v699_v21, %v682_v48 }
0x1a54   :  { %637 = vrot.lane.b32.xlu0 %v1919_v12, %s1723_s29  ;;  %703 = vrot.lane.b32.xlu1 %v701_v22, %s1723_s29 }
0x1abe   :  { %v1171_v24 = vpop.permute.xlu0 %1170 }
0x1abf   :  { %v1173_v7 = vadd.f32 %v1171_v24, %v1163_v23 }
0x1ac1   :  { %1601 = vtanh.f32 %v1173_v7 }
0x1ac6   :  { %v638_v27 = vpop.permute.xlu0 %637  ;;  %v704_v28 = vpop.permute.xlu1 %703 }
0x1ac7   :  { %v1602_v16 = vpop.eup %1601  ;;  %641 = vst.msk [vmem:[#allocation2 + $0x30] sm:$0xff] %vm124_vm0, %v638_v27 }
0x1ac8   :  { %707 = vst.msk [vmem:[#allocation2 + $0x38] sm:$0xff] %vm124_vm0, %v704_v28  ;;  %1176 = vrot.lane.b32.xlu2 %v1602_v16, %s1733_s21 }
0x1ace   :  { %v726_v17 = vld [vmem:[#allocation2 + $0x30] sm:$0xff] }
0x1acf   :  { %v727_v29 = vld [vmem:[#allocation2 + $0x38] sm:$0xff] }
0x1ad0   :  { %v731_v8 = vpack.c.bf16 %v727_v29, %v726_v17 }
0x1ad2   :  { %1437 = vmatmul.msk.bf16.gmra.mxu3 %vm124_vm0, %v731_v8 }
0x1b22   :  { %v1177_v12 = vpop.permute.xlu2 %1176 }
0x1b23   :  { %v2016_v30 = vmul.f32 %v1177_v12, %v1160_v18 }
0x1b25   :  { %v1186_v31 = vpack.c.bf16 %v2016_v30, %v2016_v30 }
0x1b27   :  { %1188 = vrot.lane.b32.xlu2 %v1186_v31, %s1723_s29 }
0x1b55   :  { %v783_v32 = vpop.f32.mrf.mxu3 }
0x1b56   :  { %v784_v20 = vadd.f32 %v1907_v25, %v783_v32 }
0x1b5d   :  { %v785_v62 = vpop.f32.mrf.mxu3 }
0x1b5e   :  { %v786_v63 = vadd.f32 %v1907_v25, %v785_v62 }
0x1b81   :  { %v1189_v54 = vpop.permute.xlu2 %1188 }
0x1b82   :  { %1457 = vmatmul.msk.bf16.vlgmr.msrb.gmra.mxu1 %vm124_vm0, %v1189_v54 }
0x1bff   :  { %v1202_v33 = vpop.f32.mrf.mxu1 }
0x1c00   :  { %v1206_v36 = vadd.f32 %v1202_v33, %v784_v20  ;;  %v1484_v20 = vld [vmem:[#allocation10 + $0x1] ss:$0 sm:$0xff] }
0x1c02   :  { %1603 = vtanh.f32 %v1206_v36  ;;  %v1458_v40 = vmul.f32 -1.442695, %v1206_v36  ;;  %v1483_v36 = vld [vmem:[#allocation10] ss:$0 sm:$0xff] }
0x1c04   :  { %1605 = vpow2.f32 %v1458_v40 }
0x1c07   :  { %v1204_v38 = vpop.f32.mrf.mxu1 }
0x1c08   :  { %v1604_v39 = vpop.eup %1603  ;;  %v1485_v38 = vld [vmem:[#allocation10 + $0x2] ss:$0 sm:$0xff] }
0x1c09   :  { %1229 = vrot.lane.b32.xlu0 %v1604_v39, %s1733_s21 }
0x1c0a   :  { %v1606_v34 = vpop.eup %1605 }
0x1c0b   :  { %v1210_v42 = vadd.f32 1.0, %v1606_v34 }
0x1c0d   :  { %1607 = vrcp.f32 %v1210_v42  ;;  %v1222_v47 = vand.u32 2147483648, %v1210_v42  ;;  %vm1216_vm13 = vweird.f32 %v1210_v42  ;;  %v1220_v48 = vand.u32 2147483647, %v1210_v42 }
0x1c0f   :  { %v1223_v50 = vor.u32 1.1754944e-38, %v1222_v47  ;;  %vm1221_vm15 = vcmp.eq.f32.partialorder %v1220_v48, 8.507059e+37  ;;  %v1488_v47 = vld [vmem:[#allocation10 + $0x5] ss:$0 sm:$0xff] }
0x1c13   :  { %v1608_v43 = vpop.eup %1607 }
0x1c14   :  { %v1212_v44 = vmul.f32 %v1608_v43, %v1210_v42  ;;  %vm1217_vm12 = vweird.f32 %v1608_v43 }
0x1c15   :  { %vm1218_vm14 = vmor %vm1216_vm13, %vm1217_vm12 }
0x1c16   :  { %v1213_v45 = vsub.f32 1.0, %v1212_v44 }
0x1c18   :  { %v1214_v46 = vmul.f32 %v1608_v43, %v1213_v45 }
0x1c1a   :  { %v1215_v37 = vadd.f32 %v1608_v43, %v1214_v46 }
0x1c1c   :  { %v1219_v49 = vsel %vm1218_vm14, %v1608_v43, %v1215_v37  ;;  %v1486_v43 = vld [vmem:[#allocation10 + $0x3] ss:$0 sm:$0xff]  ;;  %v1487_v37 = vld [vmem:[#allocation10 + $0x4] ss:$0 sm:$0xff] }
0x1c1d   :  { %v1224_v4 = vsel %vm1221_vm15, %v1223_v50, %v1219_v49 }
0x1c1e   :  { %v1227_v55 = vmul.f32 %v1224_v4, %v1173_v7 }
0x1c7b   :  { %v1230_v51 = vpop.permute.xlu0 %1229 }
0x1c7c   :  { %v1232_v53 = vmul.f32 %v1230_v51, %v1224_v4 }
0x1c7e   :  { %1234 = vrot.lane.b32.xlu1 %v1232_v53, %s1733_s21 }
0x1cf0   :  { %v1235_v56 = vpop.permute.xlu1 %1234 }
0x1cf1   :  { %v1237_v57 = vadd.f32 %v1235_v56, %v1227_v55  ;;  %v1489_v56 = vld [vmem:[#allocation10 + $0x6] ss:$0 sm:$0xff] }
0x1cf3   :  { %1609 = vtanh.f32 %v1237_v57 }
0x1cf9   :  { %v1610_v58 = vpop.eup %1609 }
0x1cfa   :  { %1240 = vrot.lane.b32.xlu2 %v1610_v58, %s1733_s21 }
0x1d54   :  { %v1241_v11 = vpop.permute.xlu2 %1240 }
0x1d55   :  { %v1243_v59 = vmul.f32 %v1241_v11, %v1224_v4  ;;  %v1490_v11 = vld [vmem:[#allocation10 + $0x7] ss:$0 sm:$0xff] }
0x1d57   :  { %v1250_v60 = vpack.c.bf16 %v1243_v59, %v1243_v59 }
0x1d59   :  { %1252 = vrot.lane.b32.xlu0 %v1250_v60, %s1723_s29 }
0x1dcb   :  { %v1253_v61 = vpop.permute.xlu0 %1252 }
0x1dcc   :  { %1459 = vmatmul.msk.bf16.vlgmr.msrb.gmra.mxu2 %vm124_vm0, %v1253_v61 }
0x1e4f   :  { %v1266_v2 = vpop.f32.mrf.mxu2 }
0x1e50   :  { %v1270_v5 = vadd.f32 %v1266_v2, %v786_v63 }
0x1e52   :  { %1611 = vtanh.f32 %v1270_v5  ;;  %v1460_v10 = vmul.f32 -1.442695, %v1270_v5  ;;  %v1379_v5 = vstv %s2066_s5 }
0x1e54   :  { %1613 = vpow2.f32 %v1460_v10 }
0x1e57   :  { %v1268_v6 = vpop.f32.mrf.mxu2 }
0x1e58   :  { %v1612_v9 = vpop.eup %1611 }
0x1e59   :  { %1293 = vrot.lane.b32.xlu1 %v1612_v9, %s1733_s21 }
0x1e5a   :  { %v1614_v0 = vpop.eup %1613 }
0x1e5b   :  { %v1274_v3 = vadd.f32 1.0, %v1614_v0 }
0x1e5d   :  { %1615 = vrcp.f32 %v1274_v3  ;;  %v1286_v19 = vand.u32 2147483648, %v1274_v3  ;;  %vm1280_vm2 = vweird.f32 %v1274_v3  ;;  %v1284_v21 = vand.u32 2147483647, %v1274_v3 }
0x1e5f   :  { %v1287_v22 = vor.u32 1.1754944e-38, %v1286_v19  ;;  %vm1285_vm4 = vcmp.eq.f32.partialorder %v1284_v21, 8.507059e+37 }
0x1e61   :  { %861 = vrot.lane.b32.xlu1 %v1924_v14, %s1723_s29 }
0x1e63   :  { %v1616_v25 = vpop.eup %1615 }
0x1e64   :  { %v1276_v1 = vmul.f32 %v1616_v25, %v1274_v3  ;;  %vm1281_vm1 = vweird.f32 %v1616_v25 }
0x1e65   :  { %vm1282_vm3 = vmor %vm1280_vm2, %vm1281_vm1 }
0x1e66   :  { %v1277_v13 = vsub.f32 1.0, %v1276_v1 }
0x1e68   :  { %v1278_v15 = vmul.f32 %v1616_v25, %v1277_v13 }
0x1e69   :  { %1053 = vrot.lane.b32.xlu1 %v1977_v35, %s1723_s29 }
0x1e6a   :  { %v1279_v18 = vadd.f32 %v1616_v25, %v1278_v15 }
0x1e6c   :  { %v1283_v14 = vsel %vm1282_vm3, %v1616_v25, %v1279_v18 }
0x1e6d   :  { %v1288_v23 = vsel %vm1285_vm4, %v1287_v22, %v1283_v14 }
0x1e6e   :  { %v1291_v16 = vmul.f32 %v1288_v23, %v1237_v57 }
0x1e71   :  { %1245 = vrot.lane.b32.xlu1 %v1243_v59, %s1723_s29 }
0x1ecb   :  { %v1294_v35 = vpop.permute.xlu1 %1293 }
0x1ecc   :  { %v1296_v24 = vmul.f32 %v1294_v35, %v1288_v23 }
0x1ece   :  { %1298 = vrot.lane.b32.xlu2 %v1296_v24, %s1733_s21 }
0x1ed3   :  { %v862_v7 = vpop.permute.xlu1 %861 }
0x1ed4   :  { %864 = vst.msk [vmem:[#allocation2] sm:$0xff] %vm124_vm0, %v862_v7 }
0x1ed6   :  { %925 = vrot.lane.b32.xlu2 %v1948_v52, %s1723_s29 }
0x1edb   :  { %v1054_v27 = vpop.permute.xlu1 %1053  ;;  %v1313_v39 = vld [vmem:[#allocation2] sm:$0xff] }
0x1edc   :  { %1056 = vst.msk [vmem:[#allocation2 + $0x18] sm:$0xff] %vm124_vm0, %v1054_v27  ;;  %v1318_v34 = vmul.f32 %v1483_v36, %v1313_v39 }
0x1ede   :  { %1117 = vrot.lane.b32.xlu2 %v1996_v41, %s1723_s29 }
0x1ee3   :  { %v1246_v28 = vpop.permute.xlu1 %1245  ;;  %v1335_v44 = vld [vmem:[#allocation2 + $0x18] sm:$0xff] }
0x1ee4   :  { %1248 = vst.msk [vmem:[#allocation2 + $0x30] sm:$0xff] %vm124_vm0, %v1246_v28  ;;  %v1341_v46 = vmul.f32 %v1486_v43, %v1335_v44 }
0x1eeb   :  { %v1359_v57 = vld [vmem:[#allocation2 + $0x30] sm:$0xff] }
0x1eec   :  { %v1365_v59 = vmul.f32 %v1489_v56, %v1359_v57 }
0x1f28   :  { %v1299_v17 = vpop.permute.xlu2 %1298 }
0x1f29   :  { %v1301_v29 = vadd.f32 %v1299_v17, %v1291_v16 }
0x1f2b   :  { %1617 = vtanh.f32 %v1301_v29 }
0x1f30   :  { %v926_v8 = vpop.permute.xlu2 %925 }
0x1f31   :  { %v1618_v12 = vpop.eup %1617  ;;  %928 = vst.msk [vmem:[#allocation2 + $0x8] sm:$0xff] %vm124_vm0, %v926_v8 }
0x1f32   :  { %1304 = vrot.lane.b32.xlu0 %v1618_v12, %s1733_s21 }
0x1f38   :  { %v1118_v52 = vpop.permute.xlu2 %1117  ;;  %v1319_v33 = vld [vmem:[#allocation2 + $0x8] sm:$0xff] }
0x1f39   :  { %1120 = vst.msk [vmem:[#allocation2 + $0x20] sm:$0xff] %vm124_vm0, %v1118_v52 }
0x1f3a   :  { %989 = vrot.lane.b32.xlu0 %v1960_v26, %s1723_s29  ;;  %v1325_v26 = vmul.f32 %v1484_v20, %v1319_v33 }
0x1f40   :  { %v1343_v48 = vld [vmem:[#allocation2 + $0x20] sm:$0xff] }
0x1f41   :  { %v1349_v4 = vmul.f32 %v1487_v37, %v1343_v48 }
0x1f42   :  { %1181 = vrot.lane.b32.xlu0 %v2016_v30, %s1723_s29  ;;  %v1326_v30 = vadd.f32 %v1325_v26, %v1318_v34 }
0x1fa4   :  { %v1305_v41 = vpop.permute.xlu0 %1304 }
0x1fa5   :  { %v1307_v31 = vmul.f32 %v1305_v41, %v1288_v23 }
0x1fa7   :  { %1309 = vrot.lane.b32.xlu2 %v1307_v31, %s1723_s29 }
0x1fac   :  { %v990_v54 = vpop.permute.xlu0 %989 }
0x1fad   :  { %992 = vst.msk [vmem:[#allocation2 + $0x10] sm:$0xff] %vm124_vm0, %v990_v54 }
0x1fb4   :  { %v1182_v32 = vpop.permute.xlu0 %1181  ;;  %v1327_v40 = vld [vmem:[#allocation2 + $0x10] sm:$0xff] }
0x1fb5   :  { %1184 = vst.msk [vmem:[#allocation2 + $0x28] sm:$0xff] %vm124_vm0, %v1182_v32  ;;  %v1333_v42 = vmul.f32 %v1485_v38, %v1327_v40 }
0x1fb7   :  { %v1334_v45 = vadd.f32 %v1333_v42, %v1326_v30 }
0x1fb9   :  { %v1342_v50 = vadd.f32 %v1341_v46, %v1334_v45 }
0x1fbb   :  { %v1350_v55 = vadd.f32 %v1349_v4, %v1342_v50 }
0x1fbc   :  { %v1351_v49 = vld [vmem:[#allocation2 + $0x28] sm:$0xff] }
0x1fbd   :  { %v1357_v53 = vmul.f32 %v1488_v47, %v1351_v49 }
0x1fbf   :  { %v1358_v58 = vadd.f32 %v1357_v53, %v1350_v55 }
0x1fc1   :  { %v1366_v61 = vadd.f32 %v1365_v59, %v1358_v58 }
0x2001   :  { %v1310_v51 = vpop.permute.xlu2 %1309 }
0x2002   :  { %1312 = vst.msk [vmem:[#allocation2 + $0x38] sm:$0xff] %vm124_vm0, %v1310_v51 }
0x2009   :  { %v1367_v60 = vld [vmem:[#allocation2 + $0x38] sm:$0xff] }
0x200a   :  { %v1373_v62 = vmul.f32 %v1490_v11, %v1367_v60 }
0x200c   :  { %v1374_v63 = vadd.f32 %v1373_v62, %v1366_v61 }
0x200e   :  { %v1375_v2 = vsel %vm124_vm0, %v1374_v63, 0.0 }
0x200f   :  { %1376 = vadd.xlane.f32.xlu0 %v1375_v2 }
0x2082   :  { %v1377_v6 = vpop.xlane.xlu0 %1376 }
0x2083   :  { %v1380_v9 = vadd.f32 %v1379_v5, %v1377_v6 }
0x2085   :  { %1382 = vst.msk [vmem:[%s2067_s6] sm:$0xff] %vm1381_vm5, %v1380_v9 }
0x2086   :  { %1387 = vsyncpa [#allocation6], 1 }
0x2087   :  { %1388 = vsyncpa [#allocation8], 1 }
0x2088   :  { %1389 = vsyncpa [#allocation11], 1 }

</bundles_post_ra>
